<compile_context>
chip_gen: v7x
topology: tpu7x:2x2x1
jax: 0.10.0
libtpu: 0.0.40
codegen_flags: <defaults>
</compile_context>

<pallas_src>
import functools

import numpy as np

import jax
import jax.numpy as jnp
from jax.experimental import pallas as pl
from jax.experimental.pallas import tpu as pltpu


# -----------------------------------------------------------------------------
# Fused kernel: conv3d(3x3x3, pad=1) + folded BN + ReLU + nearest upsample
# (as a sublane broadcast) + multiply-with-low.  One grid step processes
# `batch_block` batch elements folded onto the lane axis (N = batch_block*D*H*W).
# -----------------------------------------------------------------------------
def _seb_dw_kernel(x_ref, low_ref, w_ref, b_ref, m_ref, o_ref, *, H, W, cout):
    """
    x_ref  : (1, Cin, N)        f32   high feature, N = batch_block * D*H*W
    low_ref: (1, Cout, s^3, N)  f32   low feature, sub-cell offsets on sublane-group axis
    w_ref  : (3, Cout, 9*Cin)   bf16  conv weights (BN scale folded), grouped by kd
    b_ref  : (Cout, 1)          f32   conv bias + BN shift folded
    m_ref  : (6, 1, N)          f32   0/1 boundary masks [d-,d+,h-,h+,w-,w+]
    o_ref  : (1, Cout, s^3, N)  f32   low * upsample(relu(bn(conv(high))))
    """
    n = x_ref.shape[-1]
    hw = H * W
    x = x_ref[0]                                      # (Cin, N) f32

    # Single-axis boundary masks, loaded once (hoisted).
    okd = {-1: m_ref[0], 1: m_ref[1]}                 # each (1, N) f32
    okh = {-1: m_ref[2], 1: m_ref[3]}
    okw = {-1: m_ref[4], 1: m_ref[5]}

    # Factorized tap construction:  roll along d, mask; then h, mask; then w,
    # mask.  pltpu.roll(x, -off)[p] == x[p + off]; any wrap-around (including
    # crossing a folded-batch boundary) lands only on positions whose own-axis
    # mask is 0, and each stage masks immediately, so no garbage propagates.
    acc = jnp.zeros((cout, n), jnp.float32)
    for kd in range(3):                               # one K = 9*Cin MXU pass per depth offset
        dd = kd - 1
        xd = x if dd == 0 else pltpu.roll(x, (-dd * hw) % n, 1) * okd[dd]
        taps = []
        for kh in range(3):
            dh = kh - 1
            xdh = xd if dh == 0 else pltpu.roll(xd, (-dh * W) % n, 1) * okh[dh]
            for kw in range(3):
                dw = kw - 1
                t = xdh if dw == 0 else pltpu.roll(xdh, (-dw) % n, 1) * okw[dw]
                taps.append(t)
        patch = jnp.concatenate(taps, axis=0).astype(jnp.bfloat16)   # (9*Cin, N)
        acc = acc + jnp.dot(w_ref[kd], patch, preferred_element_type=jnp.float32)

    # Conv + folded BN + ReLU (f32).
    y = jnp.maximum(acc + b_ref[...], 0.0)            # (Cout, N)

    # Nearest upsample == broadcast over the s^3 sub-cell axis; fuse the multiply
    # with low_feature.  All in f32 on the VPU (no MXU, no bf16 round).
    o_ref[0] = low_ref[0] * y[:, None, :]             # (Cout, s^3, N)


# -----------------------------------------------------------------------------
# Host-side helpers
# -----------------------------------------------------------------------------
def _neighbor_masks(D, H, W, reps):
    """(6, 1, reps*S) f32 0/1 masks: rows = [d-1 ok, d+1 ok, h-1 ok, h+1 ok, w-1 ok, w+1 ok]."""
    S = D * H * W
    p = np.arange(S)
    d = p // (H * W)
    h = (p // W) % H
    w = p % W
    rows = np.stack([
        d >= 1, d <= D - 2,
        h >= 1, h <= H - 2,
        w >= 1, w <= W - 2,
    ]).astype(np.float32)                              # (6, S)
    rows = np.tile(rows, (1, reps))                    # (6, reps*S); lane index = b*S + p
    return jnp.asarray(rows.reshape(6, 1, reps * S), jnp.float32)


def seb_dw_forward(low_feature, high_feature, params, up_scale=2, batch_block=None):
    """low_feature: (B, Cout, s*D, s*H, s*W); high_feature: (B, Cin, D, H, W). NCDHW."""
    B, Cin, D, H, W = high_feature.shape
    Cout = low_feature.shape[1]
    s = up_scale
    s3 = s ** 3
    S = D * H * W
    assert low_feature.shape == (B, Cout, s * D, s * H, s * W)

    if batch_block is None:
        batch_block = B            # fold all batches into the lane axis (best on v5e/v6e)
    assert B % batch_block == 0
    G = B // batch_block           # grid length; use batch_block = B//2 on v7x (2 TCs)
    N = batch_block * S

    # ---- layout plumbing in the wrapper (tiny tensors; all lane-dense in-kernel) ----
    # high -> (G, Cin, N) with lane index b_local*S + p
    x_f = (high_feature.reshape(G, batch_block, Cin, S)
           .transpose(0, 2, 1, 3)
           .reshape(G, Cin, N))

    # low -> (G, Cout, s^3, N): sub-cell offsets (rd, rh, rw) become a sublane-group axis
    low_f = (low_feature
             .reshape(B, Cout, D, s, H, s, W, s)
             .transpose(0, 1, 3, 5, 7, 2, 4, 6)        # (B, Cout, rd, rh, rw, D, H, W)
             .reshape(G, batch_block, Cout, s3, S)
             .transpose(0, 2, 3, 1, 4)
             .reshape(G, Cout, s3, N))

    nbm = _neighbor_masks(D, H, W, batch_block)        # (6, 1, N) f32

    kernel = functools.partial(_seb_dw_kernel, H=H, W=W, cout=Cout)
    out_f = pl.pallas_call(
        kernel,
        out_shape=jax.ShapeDtypeStruct((G, Cout, s3, N), jnp.float32),
        grid=(G,),
        in_specs=[
            pl.BlockSpec((1, Cin, N), lambda g: (g, 0, 0)),
            pl.BlockSpec((1, Cout, s3, N), lambda g: (g, 0, 0, 0)),
            pl.BlockSpec((3, Cout, 9 * Cin), lambda g: (0, 0, 0)),
            pl.BlockSpec((Cout, 1), lambda g: (0, 0)),
            pl.BlockSpec((6, 1, N), lambda g: (0, 0, 0)),
        ],
        out_specs=pl.BlockSpec((1, Cout, s3, N), lambda g: (g, 0, 0, 0)),
        compiler_params=pltpu.CompilerParams(
            dimension_semantics=("parallel",)),
    )(x_f, low_f, params["w3"], params["b2"], nbm)

    # (G, Cout, s^3, N) -> (B, Cout, s*D, s*H, s*W)
    out = (out_f.reshape(G, Cout, s3, batch_block, S)
           .transpose(0, 3, 1, 2, 4)                   # (G, bpb, Cout, s^3, S)
           .reshape(B, Cout, s, s, s, D, H, W)
           .transpose(0, 1, 5, 2, 6, 3, 7, 4)          # (B, Cout, D, rd, H, rh, W, rw)
           .reshape(B, Cout, s * D, s * H, s * W))
    return out


# -----------------------------------------------------------------------------
# Parameter construction (deterministic; BN folded into conv for the kernel,
# raw params kept for the pure-XLA reference check).
# -----------------------------------------------------------------------------
def make_seb_dw_params(key, in_c, out_c, eps=1e-5):
    k1, k2, k3, k4, k5, k6 = jax.random.split(key, 6)
    fan_in = in_c * 27
    bound = 1.0 / np.sqrt(fan_in)
    conv_w = jax.random.uniform(k1, (out_c, in_c, 3, 3, 3), jnp.float32, -bound, bound)
    conv_b = jax.random.uniform(k2, (out_c,), jnp.float32, -bound, bound)
    gamma = 1.0 + 0.1 * jax.random.normal(k3, (out_c,), jnp.float32)
    beta = 0.1 * jax.random.normal(k4, (out_c,), jnp.float32)
    mean = 0.1 * jax.random.normal(k5, (out_c,), jnp.float32)
    var = jnp.abs(1.0 + 0.1 * jax.random.normal(k6, (out_c,), jnp.float32))

    # Fold BN (inference) into the conv; pack weights grouped by kd so the kernel
    # can contract one K = 9*Cin group per depth offset:
    #   w3[kd, co, (kh*3 + kw)*Cin + ci] = conv_w[co, ci, kd, kh, kw] * scale[co]
    scale = gamma / jnp.sqrt(var + eps)
    w_folded = conv_w * scale[:, None, None, None, None]
    w3 = jnp.transpose(w_folded, (2, 0, 3, 4, 1)).reshape(3, out_c, 9 * in_c)
    b2 = ((conv_b - mean) * scale + beta).reshape(out_c, 1)

    return {
        "w3": w3.astype(jnp.bfloat16),
        "b2": b2.astype(jnp.float32),
        "conv_w": conv_w, "conv_b": conv_b,
        "gamma": gamma, "beta": beta, "mean": mean, "var": var, "eps": eps,
    }


def seb_dw_reference(low_feature, high_feature, params, up_scale=2):
    """Pure-XLA reference matching the PyTorch module (inference-mode BN)."""
    p = params
    c = lambda v: v.reshape(1, -1, 1, 1, 1)
    y = jax.lax.conv_general_dilated(
        high_feature, p["conv_w"], window_strides=(1, 1, 1),
        padding=((1, 1), (1, 1), (1, 1)),
        dimension_numbers=("NCDHW", "OIDHW", "NCDHW"))
    y = y + c(p["conv_b"])
    y = (y - c(p["mean"])) * jax.lax.rsqrt(c(p["var"]) + p["eps"]) * c(p["gamma"]) + c(p["beta"])
    y = jnp.maximum(y, 0.0)
    for ax in (2, 3, 4):
        y = jnp.repeat(y, up_scale, axis=ax)
    return low_feature * y


# -----------------------------------------------------------------------------
if __name__ == "__main__":
    key = jax.random.PRNGKey(0)
    k_low, k_high, k_par = jax.random.split(key, 3)

    B, D, H, W = 2, 8, 8, 8
    in_c, out_c, up_scale = 8, 4, 2   # SEB_dw(low_feature=4, high_feature=8)

    high = jax.random.normal(k_high, (B, in_c, D, H, W), jnp.float32)
    low = jax.random.normal(
        k_low, (B, out_c, up_scale * D, up_scale * H, up_scale * W), jnp.float32)
    params = make_seb_dw_params(k_par, in_c, out_c)

    fwd = jax.jit(functools.partial(seb_dw_forward, params=params, up_scale=up_scale))
    out = fwd(low, high)
    jax.block_until_ready(out)

    assert out.shape == low.shape
    assert bool(jnp.all(jnp.isfinite(out)))

    # Correctness check against the pure-XLA reference (bf16 matmul tolerance).
    ref = seb_dw_reference(low, high, params, up_scale=up_scale)
    max_err = float(jnp.max(jnp.abs(out - ref)))
    tol = 0.05 * max(1.0, float(jnp.max(jnp.abs(ref))))
    assert max_err <= tol, f"max_err={max_err} tol={tol}"

    print("KERNEL_OK")
</pallas_src>

<mosaic_0001>
module attributes {stable_mosaic.version = 11 : i64} {
  func.func @_seb_dw_kernel(%arg0: i32, %arg1: memref<1x8x1024xf32, #tpu.memory_space<vmem>>, %arg2: memref<1x4x8x1024xf32, #tpu.memory_space<vmem>>, %arg3: memref<3x4x72xbf16, #tpu.memory_space<vmem>>, %arg4: memref<4x1xf32, #tpu.memory_space<vmem>>, %arg5: memref<6x1x1024xf32, #tpu.memory_space<vmem>>, %arg6: memref<1x4x8x1024xf32, #tpu.memory_space<vmem>>) attributes {dimension_semantics = [#tpu.dimension_semantics<parallel>], iteration_bounds = array<i64: 1>, scalar_prefetch = 0 : i64, scratch_operands = 0 : i64, tpu.core_type = #tpu.core_type<tc>, window_params = [{transform_indices = @transform_0, window_bounds = array<i64: 1, 8, 1024>}, {transform_indices = @transform_1, window_bounds = array<i64: 1, 4, 8, 1024>}, {pipeline_mode = #tpu.pipeline_mode<synchronous>, transform_indices = @transform_2, window_bounds = array<i64: 3, 4, 72>}, {pipeline_mode = #tpu.pipeline_mode<synchronous>, transform_indices = @transform_3, window_bounds = array<i64: 4, 1>}, {pipeline_mode = #tpu.pipeline_mode<synchronous>, transform_indices = @transform_4, window_bounds = array<i64: 6, 1, 1024>}, {transform_indices = @transform_5, window_bounds = array<i64: 1, 4, 8, 1024>}]} {
    %c0 = arith.constant 0 : index
    %c0_0 = arith.constant 0 : index
    %c0_1 = arith.constant 0 : index
    %0 = vector.load %arg1[%c0, %c0_0, %c0_1] : memref<1x8x1024xf32, #tpu.memory_space<vmem>>, vector<1x8x1024xf32>
    %1 = vector.shape_cast %0 : vector<1x8x1024xf32> to vector<8x1024xf32>
    %c0_2 = arith.constant 0 : index
    %c0_3 = arith.constant 0 : index
    %c0_4 = arith.constant 0 : index
    %2 = vector.load %arg5[%c0_2, %c0_3, %c0_4] : memref<6x1x1024xf32, #tpu.memory_space<vmem>>, vector<1x1x1024xf32>
    %3 = vector.shape_cast %2 : vector<1x1x1024xf32> to vector<1x1024xf32>
    %c1 = arith.constant 1 : index
    %c0_5 = arith.constant 0 : index
    %c0_6 = arith.constant 0 : index
    %4 = vector.load %arg5[%c1, %c0_5, %c0_6] : memref<6x1x1024xf32, #tpu.memory_space<vmem>>, vector<1x1x1024xf32>
    %5 = vector.shape_cast %4 : vector<1x1x1024xf32> to vector<1x1024xf32>
    %c2 = arith.constant 2 : index
    %c0_7 = arith.constant 0 : index
    %c0_8 = arith.constant 0 : index
    %6 = vector.load %arg5[%c2, %c0_7, %c0_8] : memref<6x1x1024xf32, #tpu.memory_space<vmem>>, vector<1x1x1024xf32>
    %7 = vector.shape_cast %6 : vector<1x1x1024xf32> to vector<1x1024xf32>
    %c3 = arith.constant 3 : index
    %c0_9 = arith.constant 0 : index
    %c0_10 = arith.constant 0 : index
    %8 = vector.load %arg5[%c3, %c0_9, %c0_10] : memref<6x1x1024xf32, #tpu.memory_space<vmem>>, vector<1x1x1024xf32>
    %9 = vector.shape_cast %8 : vector<1x1x1024xf32> to vector<1x1024xf32>
    %c4 = arith.constant 4 : index
    %c0_11 = arith.constant 0 : index
    %c0_12 = arith.constant 0 : index
    %10 = vector.load %arg5[%c4, %c0_11, %c0_12] : memref<6x1x1024xf32, #tpu.memory_space<vmem>>, vector<1x1x1024xf32>
    %11 = vector.shape_cast %10 : vector<1x1x1024xf32> to vector<1x1024xf32>
    %c5 = arith.constant 5 : index
    %c0_13 = arith.constant 0 : index
    %c0_14 = arith.constant 0 : index
    %12 = vector.load %arg5[%c5, %c0_13, %c0_14] : memref<6x1x1024xf32, #tpu.memory_space<vmem>>, vector<1x1x1024xf32>
    %13 = vector.shape_cast %12 : vector<1x1x1024xf32> to vector<1x1024xf32>
    %cst = arith.constant 0.000000e+00 : f32
    %14 = vector.broadcast %cst : f32 to vector<4x1024xf32>
    %c64_i32 = arith.constant 64 : i32
    %15 = tpu.dynamic_rotate %1 by %c64_i32 dim 1 : vector<8x1024xf32>, i32 -> vector<8x1024xf32>
    %16 = vector.broadcast %3 : vector<1x1024xf32> to vector<8x1024xf32>
    %17 = arith.mulf %15, %16 : vector<8x1024xf32>
    %c8_i32 = arith.constant 8 : i32
    %18 = tpu.dynamic_rotate %17 by %c8_i32 dim 1 : vector<8x1024xf32>, i32 -> vector<8x1024xf32>
    %19 = vector.broadcast %7 : vector<1x1024xf32> to vector<8x1024xf32>
    %20 = arith.mulf %18, %19 : vector<8x1024xf32>
    %c1_i32 = arith.constant 1 : i32
    %21 = tpu.dynamic_rotate %20 by %c1_i32 dim 1 : vector<8x1024xf32>, i32 -> vector<8x1024xf32>
    %22 = vector.broadcast %11 : vector<1x1024xf32> to vector<8x1024xf32>
    %23 = arith.mulf %21, %22 : vector<8x1024xf32>
    %c1023_i32 = arith.constant 1023 : i32
    %24 = tpu.dynamic_rotate %20 by %c1023_i32 dim 1 : vector<8x1024xf32>, i32 -> vector<8x1024xf32>
    %25 = vector.broadcast %13 : vector<1x1024xf32> to vector<8x1024xf32>
    %26 = arith.mulf %24, %25 : vector<8x1024xf32>
    %c1_i32_15 = arith.constant 1 : i32
    %27 = tpu.dynamic_rotate %17 by %c1_i32_15 dim 1 : vector<8x1024xf32>, i32 -> vector<8x1024xf32>
    %28 = vector.broadcast %11 : vector<1x1024xf32> to vector<8x1024xf32>
    %29 = arith.mulf %27, %28 : vector<8x1024xf32>
    %c1023_i32_16 = arith.constant 1023 : i32
    %30 = tpu.dynamic_rotate %17 by %c1023_i32_16 dim 1 : vector<8x1024xf32>, i32 -> vector<8x1024xf32>
    %31 = vector.broadcast %13 : vector<1x1024xf32> to vector<8x1024xf32>
    %32 = arith.mulf %30, %31 : vector<8x1024xf32>
    %c1016_i32 = arith.constant 1016 : i32
    %33 = tpu.dynamic_rotate %17 by %c1016_i32 dim 1 : vector<8x1024xf32>, i32 -> vector<8x1024xf32>
    %34 = vector.broadcast %9 : vector<1x1024xf32> to vector<8x1024xf32>
    %35 = arith.mulf %33, %34 : vector<8x1024xf32>
    %c1_i32_17 = arith.constant 1 : i32
    %36 = tpu.dynamic_rotate %35 by %c1_i32_17 dim 1 : vector<8x1024xf32>, i32 -> vector<8x1024xf32>
    %37 = vector.broadcast %11 : vector<1x1024xf32> to vector<8x1024xf32>
    %38 = arith.mulf %36, %37 : vector<8x1024xf32>
    %c1023_i32_18 = arith.constant 1023 : i32
    %39 = tpu.dynamic_rotate %35 by %c1023_i32_18 dim 1 : vector<8x1024xf32>, i32 -> vector<8x1024xf32>
    %40 = vector.broadcast %13 : vector<1x1024xf32> to vector<8x1024xf32>
    %41 = arith.mulf %39, %40 : vector<8x1024xf32>
    %42 = tpu.concatenate %23, %20, %26, %29, %17, %32, %38, %35, %41 in 0 : vector<8x1024xf32>, vector<8x1024xf32>, vector<8x1024xf32>, vector<8x1024xf32>, vector<8x1024xf32>, vector<8x1024xf32>, vector<8x1024xf32>, vector<8x1024xf32>, vector<8x1024xf32> -> vector<72x1024xf32>
    %43 = arith.truncf %42 : vector<72x1024xf32> to vector<72x1024xbf16>
    %c0_19 = arith.constant 0 : index
    %c0_20 = arith.constant 0 : index
    %c0_21 = arith.constant 0 : index
    %44 = vector.load %arg3[%c0_19, %c0_20, %c0_21] : memref<3x4x72xbf16, #tpu.memory_space<vmem>>, vector<1x4x72xbf16>
    %45 = vector.shape_cast %44 : vector<1x4x72xbf16> to vector<4x72xbf16>
    %cst_22 = arith.constant dense<0.000000e+00> : vector<4x1024xf32>
    %46 = tpu.matmul %45, %43, %cst_22 {dimension_numbers = #tpu.dot_dimension_numbers<[1], [0], [0], [1], [0, 0, 1, 1], [], []>} : vector<4x72xbf16>, vector<72x1024xbf16>, vector<4x1024xf32> -> vector<4x1024xf32>
    %47 = arith.addf %14, %46 : vector<4x1024xf32>
    %c8_i32_23 = arith.constant 8 : i32
    %48 = tpu.dynamic_rotate %1 by %c8_i32_23 dim 1 : vector<8x1024xf32>, i32 -> vector<8x1024xf32>
    %49 = vector.broadcast %7 : vector<1x1024xf32> to vector<8x1024xf32>
    %50 = arith.mulf %48, %49 : vector<8x1024xf32>
    %c1_i32_24 = arith.constant 1 : i32
    %51 = tpu.dynamic_rotate %50 by %c1_i32_24 dim 1 : vector<8x1024xf32>, i32 -> vector<8x1024xf32>
    %52 = vector.broadcast %11 : vector<1x1024xf32> to vector<8x1024xf32>
    %53 = arith.mulf %51, %52 : vector<8x1024xf32>
    %c1023_i32_25 = arith.constant 1023 : i32
    %54 = tpu.dynamic_rotate %50 by %c1023_i32_25 dim 1 : vector<8x1024xf32>, i32 -> vector<8x1024xf32>
    %55 = vector.broadcast %13 : vector<1x1024xf32> to vector<8x1024xf32>
    %56 = arith.mulf %54, %55 : vector<8x1024xf32>
    %c1_i32_26 = arith.constant 1 : i32
    %57 = tpu.dynamic_rotate %1 by %c1_i32_26 dim 1 : vector<8x1024xf32>, i32 -> vector<8x1024xf32>
    %58 = vector.broadcast %11 : vector<1x1024xf32> to vector<8x1024xf32>
    %59 = arith.mulf %57, %58 : vector<8x1024xf32>
    %c1023_i32_27 = arith.constant 1023 : i32
    %60 = tpu.dynamic_rotate %1 by %c1023_i32_27 dim 1 : vector<8x1024xf32>, i32 -> vector<8x1024xf32>
    %61 = vector.broadcast %13 : vector<1x1024xf32> to vector<8x1024xf32>
    %62 = arith.mulf %60, %61 : vector<8x1024xf32>
    %c1016_i32_28 = arith.constant 1016 : i32
    %63 = tpu.dynamic_rotate %1 by %c1016_i32_28 dim 1 : vector<8x1024xf32>, i32 -> vector<8x1024xf32>
    %64 = vector.broadcast %9 : vector<1x1024xf32> to vector<8x1024xf32>
    %65 = arith.mulf %63, %64 : vector<8x1024xf32>
    %c1_i32_29 = arith.constant 1 : i32
    %66 = tpu.dynamic_rotate %65 by %c1_i32_29 dim 1 : vector<8x1024xf32>, i32 -> vector<8x1024xf32>
    %67 = vector.broadcast %11 : vector<1x1024xf32> to vector<8x1024xf32>
    %68 = arith.mulf %66, %67 : vector<8x1024xf32>
    %c1023_i32_30 = arith.constant 1023 : i32
    %69 = tpu.dynamic_rotate %65 by %c1023_i32_30 dim 1 : vector<8x1024xf32>, i32 -> vector<8x1024xf32>
    %70 = vector.broadcast %13 : vector<1x1024xf32> to vector<8x1024xf32>
    %71 = arith.mulf %69, %70 : vector<8x1024xf32>
    %72 = tpu.concatenate %53, %50, %56, %59, %1, %62, %68, %65, %71 in 0 : vector<8x1024xf32>, vector<8x1024xf32>, vector<8x1024xf32>, vector<8x1024xf32>, vector<8x1024xf32>, vector<8x1024xf32>, vector<8x1024xf32>, vector<8x1024xf32>, vector<8x1024xf32> -> vector<72x1024xf32>
    %73 = arith.truncf %72 : vector<72x1024xf32> to vector<72x1024xbf16>
    %c1_31 = arith.constant 1 : index
    %c0_32 = arith.constant 0 : index
    %c0_33 = arith.constant 0 : index
    %74 = vector.load %arg3[%c1_31, %c0_32, %c0_33] : memref<3x4x72xbf16, #tpu.memory_space<vmem>>, vector<1x4x72xbf16>
    %75 = vector.shape_cast %74 : vector<1x4x72xbf16> to vector<4x72xbf16>
    %cst_34 = arith.constant dense<0.000000e+00> : vector<4x1024xf32>
    %76 = tpu.matmul %75, %73, %cst_34 {dimension_numbers = #tpu.dot_dimension_numbers<[1], [0], [0], [1], [0, 0, 1, 1], [], []>} : vector<4x72xbf16>, vector<72x1024xbf16>, vector<4x1024xf32> -> vector<4x1024xf32>
    %77 = arith.addf %47, %76 : vector<4x1024xf32>
    %c960_i32 = arith.constant 960 : i32
    %78 = tpu.dynamic_rotate %1 by %c960_i32 dim 1 : vector<8x1024xf32>, i32 -> vector<8x1024xf32>
    %79 = vector.broadcast %5 : vector<1x1024xf32> to vector<8x1024xf32>
    %80 = arith.mulf %78, %79 : vector<8x1024xf32>
    %c8_i32_35 = arith.constant 8 : i32
    %81 = tpu.dynamic_rotate %80 by %c8_i32_35 dim 1 : vector<8x1024xf32>, i32 -> vector<8x1024xf32>
    %82 = vector.broadcast %7 : vector<1x1024xf32> to vector<8x1024xf32>
    %83 = arith.mulf %81, %82 : vector<8x1024xf32>
    %c1_i32_36 = arith.constant 1 : i32
    %84 = tpu.dynamic_rotate %83 by %c1_i32_36 dim 1 : vector<8x1024xf32>, i32 -> vector<8x1024xf32>
    %85 = vector.broadcast %11 : vector<1x1024xf32> to vector<8x1024xf32>
    %86 = arith.mulf %84, %85 : vector<8x1024xf32>
    %c1023_i32_37 = arith.constant 1023 : i32
    %87 = tpu.dynamic_rotate %83 by %c1023_i32_37 dim 1 : vector<8x1024xf32>, i32 -> vector<8x1024xf32>
    %88 = vector.broadcast %13 : vector<1x1024xf32> to vector<8x1024xf32>
    %89 = arith.mulf %87, %88 : vector<8x1024xf32>
    %c1_i32_38 = arith.constant 1 : i32
    %90 = tpu.dynamic_rotate %80 by %c1_i32_38 dim 1 : vector<8x1024xf32>, i32 -> vector<8x1024xf32>
    %91 = vector.broadcast %11 : vector<1x1024xf32> to vector<8x1024xf32>
    %92 = arith.mulf %90, %91 : vector<8x1024xf32>
    %c1023_i32_39 = arith.constant 1023 : i32
    %93 = tpu.dynamic_rotate %80 by %c1023_i32_39 dim 1 : vector<8x1024xf32>, i32 -> vector<8x1024xf32>
    %94 = vector.broadcast %13 : vector<1x1024xf32> to vector<8x1024xf32>
    %95 = arith.mulf %93, %94 : vector<8x1024xf32>
    %c1016_i32_40 = arith.constant 1016 : i32
    %96 = tpu.dynamic_rotate %80 by %c1016_i32_40 dim 1 : vector<8x1024xf32>, i32 -> vector<8x1024xf32>
    %97 = vector.broadcast %9 : vector<1x1024xf32> to vector<8x1024xf32>
    %98 = arith.mulf %96, %97 : vector<8x1024xf32>
    %c1_i32_41 = arith.constant 1 : i32
    %99 = tpu.dynamic_rotate %98 by %c1_i32_41 dim 1 : vector<8x1024xf32>, i32 -> vector<8x1024xf32>
    %100 = vector.broadcast %11 : vector<1x1024xf32> to vector<8x1024xf32>
    %101 = arith.mulf %99, %100 : vector<8x1024xf32>
    %c1023_i32_42 = arith.constant 1023 : i32
    %102 = tpu.dynamic_rotate %98 by %c1023_i32_42 dim 1 : vector<8x1024xf32>, i32 -> vector<8x1024xf32>
    %103 = vector.broadcast %13 : vector<1x1024xf32> to vector<8x1024xf32>
    %104 = arith.mulf %102, %103 : vector<8x1024xf32>
    %105 = tpu.concatenate %86, %83, %89, %92, %80, %95, %101, %98, %104 in 0 : vector<8x1024xf32>, vector<8x1024xf32>, vector<8x1024xf32>, vector<8x1024xf32>, vector<8x1024xf32>, vector<8x1024xf32>, vector<8x1024xf32>, vector<8x1024xf32>, vector<8x1024xf32> -> vector<72x1024xf32>
    %106 = arith.truncf %105 : vector<72x1024xf32> to vector<72x1024xbf16>
    %c2_43 = arith.constant 2 : index
    %c0_44 = arith.constant 0 : index
    %c0_45 = arith.constant 0 : index
    %107 = vector.load %arg3[%c2_43, %c0_44, %c0_45] : memref<3x4x72xbf16, #tpu.memory_space<vmem>>, vector<1x4x72xbf16>
    %108 = vector.shape_cast %107 : vector<1x4x72xbf16> to vector<4x72xbf16>
    %cst_46 = arith.constant dense<0.000000e+00> : vector<4x1024xf32>
    %109 = tpu.matmul %108, %106, %cst_46 {dimension_numbers = #tpu.dot_dimension_numbers<[1], [0], [0], [1], [0, 0, 1, 1], [], []>} : vector<4x72xbf16>, vector<72x1024xbf16>, vector<4x1024xf32> -> vector<4x1024xf32>
    %110 = arith.addf %77, %109 : vector<4x1024xf32>
    %c0_47 = arith.constant 0 : index
    %c0_48 = arith.constant 0 : index
    %111 = vector.load %arg4[%c0_47, %c0_48] : memref<4x1xf32, #tpu.memory_space<vmem>>, vector<4x1xf32>
    %112 = vector.broadcast %111 : vector<4x1xf32> to vector<4x1024xf32>
    %113 = arith.addf %110, %112 : vector<4x1024xf32>
    %cst_49 = arith.constant 0.000000e+00 : f32
    %114 = vector.broadcast %cst_49 : f32 to vector<4x1024xf32>
    %115 = arith.maximumf %113, %114 : vector<4x1024xf32>
    %c0_50 = arith.constant 0 : index
    %c0_51 = arith.constant 0 : index
    %c0_52 = arith.constant 0 : index
    %c0_53 = arith.constant 0 : index
    %116 = vector.load %arg2[%c0_50, %c0_51, %c0_52, %c0_53] : memref<1x4x8x1024xf32, #tpu.memory_space<vmem>>, vector<1x4x8x1024xf32>
    %117 = vector.shape_cast %116 : vector<1x4x8x1024xf32> to vector<4x8x1024xf32>
    %118 = vector.shape_cast %115 : vector<4x1024xf32> to vector<4x1x1024xf32>
    %119 = vector.broadcast %118 : vector<4x1x1024xf32> to vector<4x8x1024xf32>
    %120 = arith.mulf %117, %119 : vector<4x8x1024xf32>
    %c0_54 = arith.constant 0 : index
    %c0_55 = arith.constant 0 : index
    %c0_56 = arith.constant 0 : index
    %c0_57 = arith.constant 0 : index
    %121 = vector.load %arg6[%c0_54, %c0_55, %c0_56, %c0_57] : memref<1x4x8x1024xf32, #tpu.memory_space<vmem>>, vector<1x4x8x1024xf32>
    %122 = vector.shape_cast %121 : vector<1x4x8x1024xf32> to vector<4x8x1024xf32>
    %123 = vector.shape_cast %120 : vector<4x8x1024xf32> to vector<1x4x8x1024xf32>
    tpu.vector_store %arg6[%c0_54, %c0_55, %c0_56, %c0_57], %123 {strides = array<i32>} : memref<1x4x8x1024xf32, #tpu.memory_space<vmem>>, vector<1x4x8x1024xf32>,
    return
  }
  func.func @transform_0(%arg0: i32) -> (i32, i32, i32) {
    %c0_i32 = arith.constant 0 : i32
    %c0_i32_0 = arith.constant 0 : i32
    %c0_i32_1 = arith.constant 0 : i32
    return %arg0, %c0_i32, %c0_i32_0 : i32, i32, i32
  }
  func.func @transform_1(%arg0: i32) -> (i32, i32, i32, i32) {
    %c0_i32 = arith.constant 0 : i32
    %c0_i32_0 = arith.constant 0 : i32
    %c0_i32_1 = arith.constant 0 : i32
    %c0_i32_2 = arith.constant 0 : i32
    return %arg0, %c0_i32, %c0_i32_0, %c0_i32_1 : i32, i32, i32, i32
  }
  func.func @transform_2(%arg0: i32) -> (i32, i32, i32) {
    %c0_i32 = arith.constant 0 : i32
    %c0_i32_0 = arith.constant 0 : i32
    %c0_i32_1 = arith.constant 0 : i32
    %c0_i32_2 = arith.constant 0 : i32
    return %c0_i32, %c0_i32_0, %c0_i32_1 : i32, i32, i32
  }
  func.func @transform_3(%arg0: i32) -> (i32, i32) {
    %c0_i32 = arith.constant 0 : i32
    %c0_i32_0 = arith.constant 0 : i32
    %c0_i32_1 = arith.constant 0 : i32
    return %c0_i32, %c0_i32_0 : i32, i32
  }
  func.func @transform_4(%arg0: i32) -> (i32, i32, i32) {
    %c0_i32 = arith.constant 0 : i32
    %c0_i32_0 = arith.constant 0 : i32
    %c0_i32_1 = arith.constant 0 : i32
    %c0_i32_2 = arith.constant 0 : i32
    return %c0_i32, %c0_i32_0, %c0_i32_1 : i32, i32, i32
  }
  func.func @transform_5(%arg0: i32) -> (i32, i32, i32, i32) {
    %c0_i32 = arith.constant 0 : i32
    %c0_i32_0 = arith.constant 0 : i32
    %c0_i32_1 = arith.constant 0 : i32
    %c0_i32_2 = arith.constant 0 : i32
    return %arg0, %c0_i32, %c0_i32_0, %c0_i32_1 : i32, i32, i32, i32
  }
}

</mosaic_0001>

<bundles_post_ra>
// kernel: seb_dw_forward.1
= control target key start
LH: loop header
LB: loop body
LE: loop exit
PB: predicated region body
PF: predicated region fallthrough
CT: control target
= control target key end

     0   :  { %s2210_s22 = smov 64   ;;  %s2211_s10 = smov 8   ;;  %v56_v8 = vlaneseq  ;;  %vm883_vm5 = vcmask 1043456   ;;  %vm879_vm6 = vcmask 588800   ;;  %s4418_s0 = inlined_call_operand.vmem [shape: f32[1,8,1024], index: 0, kind: input, shape index: {}]   ;;  %s4419_s4 = inlined_call_operand.vmem [shape: f32[6,1,1024], index: 4, kind: input, shape index: {}]   ;;  %s4420_s2 = inlined_call_operand.vmem [shape: bf16[3,4,72], index: 2, kind: input, shape index: {}]   ;;  %s4421_s3 = inlined_call_operand.vmem [shape: f32[4,1], index: 3, kind: input, shape index: {}]   ;;  %s4422_s1 = inlined_call_operand.vmem [shape: f32[1,4,8,1024], index: 1, kind: input, shape index: {}]   ;;  %s4423_s5 = inlined_call_operand.vmem [shape: f32[1,4,8,1024], index: 5, kind: output, shape index: {}]  }
   0x1   :  { %v2250_v0 = vld [vmem:[%s4418_s0 + $0x10] sm:$0xff]  ;;  %v2255_v1 = vld [vmem:[%s4418_s0] sm:$0xff]  ;;  %v2262_v2 = vld [vmem:[%s4418_s0 + $0x18] sm:$0xff]  ;;  %s2212_s11 = smov 120   ;;  %s2213_s12 = smov 1  }
   0x2   :  { %44 = vrot.lane.b32.xlu1 %v2250_v0, %s2210_s22  ;;  %40 = vrot.lane.b32.xlu0 %v2255_v1, %s2210_s22  ;;  %v2267_v3 = vld [vmem:[%s4418_s0 + $0x8] sm:$0xff]  ;;  %v2274_v4 = vld [vmem:[%s4418_s0 + $0x38] sm:$0xff]  ;;  %s2214_s13 = smov 127   ;;  %v2347_v9 = vshrl.u32 %v56_v8, 7  ;;  %v2349_v10 = vand.u32 127, %v56_v8 }
   0x3   :  { %v2279_v5 = vld [vmem:[%s4418_s0 + $0x30] sm:$0xff]  ;;  %v2286_v6 = vld [vmem:[%s4418_s0 + $0x20] sm:$0xff]  ;;  %v2291_v7 = vld [vmem:[%s4418_s0 + $0x28] sm:$0xff] }
   0x4   :  { %4541 = vst [vmem:[#allocation2_spill] sm:$0xff] %v2347_v9  ;;  %v2352_v11 = vsub.s32 2, %v2347_v9  ;;  %v2355_v12 = vsub.s32 1, %v2347_v9  ;;  %v2360_v13 = vld [vmem:[%s4419_s4] sm:$0xff]  ;;  %v2365_v14 = vld [vmem:[%s4419_s4 + $0x8] sm:$0xff]  ;;  %v2368_v15 = vsub.s32 0, %v2347_v9 }
   0x5   :  { %v2371_v18 = vsub.s32 3, %v2347_v9  ;;  %vm58_vm0 = vcmp.lt.s32.totalorder %v2349_v10, 64  ;;  %v2379_v21 = vsub.s32 7, %v2347_v9  ;;  %v2382_v22 = vsub.s32 6, %v2347_v9 }
   0x6   :  { %46 = vrot.lane.b32.xlu1 %v2262_v2, %s2210_s22  ;;  %42 = vrot.lane.b32.xlu0 %v2267_v3, %s2210_s22  ;;  %4542 = vst [vmem:[#allocation3_spill] sm:$0xff] %v2352_v11  ;;  %4543 = vst [vmem:[#allocation4_spill] sm:$0xff] %v2355_v12  ;;  %v1275_v19 = vrot.slane %v2365_v14, %v2352_v11  ;;  %v75_v20 = vrot.slane %v2360_v13, %v2355_v12  ;;  %v2411_v38 = vsub.s32 5, %v2347_v9 }
   0x7   :  { %4544 = vst [vmem:[#allocation5_spill] sm:$0xff] %v2368_v15  ;;  %4545 = vst [vmem:[#allocation6_spill] sm:$0xff] %v2371_v18  ;;  %v1267_v23 = vrot.slane %v2365_v14, %v2368_v15  ;;  %v1271_v24 = vrot.slane %v2365_v14, %v2355_v12  ;;  %v83_v25 = vrot.slane %v2360_v13, %v2371_v18  ;;  %v2422_v44 = vsub.s32 4, %v2347_v9 }
   0x8   :  { %4546 = vst [vmem:[#allocation7_spill] sm:$0xff] %v2379_v21  ;;  %4547 = vst [vmem:[#allocation8_spill] sm:$0xff] %v2382_v22  ;;  %v71_v31 = vrot.slane %v2360_v13, %v2368_v15  ;;  %v1295_v34 = vrot.slane %v2365_v14, %v2379_v21  ;;  %v1291_v35 = vrot.slane %v2365_v14, %v2382_v22  ;;  %vm132_vm1 = vcmp.lt.s32.totalorder %v2349_v10, 8 }
   0x9   :  { %4552 = vst [vmem:[#allocation13_spill] sm:$0xff] %v2411_v38  ;;  %v79_v39 = vrot.slane %v2360_v13, %v2352_v11  ;;  %4553 = vst [vmem:[#allocation14_spill] sm:$0xff] %v2422_v44  ;;  %v95_v45 = vrot.slane %v2360_v13, %v2382_v22  ;;  %v1283_v50 = vrot.slane %v2365_v14, %v2422_v44  ;;  %vm418_vm2 = vcmp.lt.s32.totalorder %v2349_v10, 120 }
   0xa   :  { %54 = vrot.lane.b32.xlu1 %v2274_v4, %s2210_s22  ;;  %52 = vrot.lane.b32.xlu0 %v2279_v5, %s2210_s22  ;;  %v1287_v51 = vrot.slane %v2365_v14, %v2411_v38  ;;  %v99_v57 = vrot.slane %v2360_v13, %v2379_v21  ;;  %v87_v62 = vrot.slane %v2360_v13, %v2422_v44  ;;  %vm206_vm3 = vcmp.lt.s32.totalorder %v2349_v10, 1 }
   0xb   :  { %vm280_vm4 = vcmp.lt.s32.totalorder %v2349_v10, 127 }
   0xe   :  { %48 = vrot.lane.b32.xlu1 %v2286_v6, %s2210_s22  ;;  %50 = vrot.lane.b32.xlu0 %v2291_v7, %s2210_s22 }
  0x12   :  { %581 = vrot.lane.b32.xlu0 %v2255_v1, %s2211_s10  ;;  %583 = vrot.lane.b32.xlu1 %v2267_v3, %s2211_s10 }
  0x16   :  { %585 = vrot.lane.b32.xlu0 %v2250_v0, %s2211_s10  ;;  %587 = vrot.lane.b32.xlu1 %v2262_v2, %s2211_s10 }
  0x1a   :  { %595 = vrot.lane.b32.xlu0 %v2274_v4, %s2211_s10  ;;  %593 = vrot.lane.b32.xlu1 %v2279_v5, %s2211_s10 }
  0x1e   :  { %589 = vrot.lane.b32.xlu0 %v2286_v6, %s2211_s10  ;;  %741 = vrot.lane.b32.xlu1 %v2255_v1, %s2212_s11 }
  0x22   :  { %743 = vrot.lane.b32.xlu0 %v2267_v3, %s2212_s11  ;;  %745 = vrot.lane.b32.xlu1 %v2250_v0, %s2212_s11 }
  0x26   :  { %747 = vrot.lane.b32.xlu0 %v2262_v2, %s2212_s11  ;;  %749 = vrot.lane.b32.xlu1 %v2286_v6, %s2212_s11 }
  0x2a   :  { %755 = vrot.lane.b32.xlu0 %v2274_v4, %s2212_s11  ;;  %751 = vrot.lane.b32.xlu1 %v2291_v7, %s2212_s11 }
  0x2e   :  { %591 = vrot.lane.b32.xlu0 %v2291_v7, %s2211_s10  ;;  %753 = vrot.lane.b32.xlu1 %v2279_v5, %s2212_s11 }
  0x32   :  { %679 = vrot.lane.b32.xlu1 %v2267_v3, %s2213_s12  ;;  %677 = vrot.lane.b32.xlu0 %v2255_v1, %s2213_s12 }
  0x36   :  { %683 = vrot.lane.b32.xlu1 %v2262_v2, %s2213_s12  ;;  %681 = vrot.lane.b32.xlu0 %v2250_v0, %s2213_s12 }
  0x3a   :  { %691 = vrot.lane.b32.xlu1 %v2274_v4, %s2213_s12  ;;  %711 = vrot.lane.b32.xlu0 %v2267_v3, %s2214_s13 }
  0x3e   :  { %715 = vrot.lane.b32.xlu0 %v2262_v2, %s2214_s13  ;;  %713 = vrot.lane.b32.xlu1 %v2250_v0, %s2214_s13 }
  0x42   :  { %709 = vrot.lane.b32.xlu0 %v2255_v1, %s2214_s13  ;;  %717 = vrot.lane.b32.xlu1 %v2286_v6, %s2214_s13 }
  0x74   :  { %v45_v16 = vpop.permute.xlu1 %44  ;;  %v41_v17 = vpop.permute.xlu0 %40 }
  0x78   :  { %v47_v26 = vpop.permute.xlu1 %46  ;;  %v43_v27 = vpop.permute.xlu0 %42 }
  0x79   :  { %v63_v28 = vsel %vm58_vm0, %v45_v16, %v47_v26  ;;  %v64_v29 = vsel %vm58_vm0, %v43_v27, %v45_v16  ;;  %v65_v30 = vsel %vm58_vm0, %v41_v17, %v43_v27 }
  0x7a   :  { %v2398_v32 = vmul.f32 %v1275_v19, %v63_v28  ;;  %v2400_v33 = vmul.f32 %v75_v20, %v65_v30  ;;  %v2406_v36 = vmul.f32 %v1267_v23, %v65_v30  ;;  %v2408_v37 = vmul.f32 %v1271_v24, %v64_v29  ;;  %v2484_v23 = vld [vmem:[%s4419_s4 + $0x10] sm:$0xff] }
  0x7b   :  { %v2426_v46 = vmul.f32 %v83_v25, %v63_v28  ;;  %v2446_v56 = vmul.f32 %v79_v39, %v64_v29  ;;  %v91_v20 = vrot.slane %v2360_v13, %v2411_v38  ;;  %v2495_v13 = vrot.slane %v2484_v23, %v2368_v15 }
  0x7c   :  { %4548 = vst [vmem:[#allocation9_spill] sm:$0xff] %v2398_v32  ;;  %4549 = vst [vmem:[#allocation10_spill] sm:$0xff] %v2400_v33  ;;  %v55_v40 = vpop.permute.xlu1 %54  ;;  %118 = vrot.lane.b32.xlu1 %v2400_v33, %s2211_s10  ;;  %v53_v41 = vpop.permute.xlu0 %52  ;;  %v2508_v29 = vrot.slane %v2484_v23, %v2352_v11  ;;  %v2527_v39 = vrot.slane %v2484_v23, %v2379_v21 }
  0x7d   :  { %4550 = vst [vmem:[#allocation11_spill] sm:$0xff] %v2406_v36  ;;  %4551 = vst [vmem:[#allocation12_spill] sm:$0xff] %v2408_v37  ;;  %v66_v42 = vsel %vm58_vm0, %v55_v40, %v41_v17  ;;  %v59_v43 = vsel %vm58_vm0, %v53_v41, %v55_v40 }
  0x7e   :  { %4554 = vst [vmem:[#allocation15_spill] sm:$0xff] %v2426_v46  ;;  %v2428_v47 = vmul.f32 %v71_v31, %v66_v42  ;;  %v2430_v48 = vmul.f32 %v1295_v34, %v66_v42  ;;  %v2432_v49 = vmul.f32 %v1291_v35, %v59_v43  ;;  %4558 = vst [vmem:[#allocation19_spill] sm:$0xff] %v2446_v56 }
  0x7f   :  { %v2460_v61 = vmul.f32 %v99_v57, %v59_v43  ;;  %4565 = vst [vmem:[#allocation26_spill] sm:$0xff] %v2495_v13  ;;  %4566 = vst [vmem:[#allocation27_spill] sm:$0xff] %v2508_v29  ;;  %v2523_v35 = vrot.slane %v2484_v23, %v2355_v12 }
  0x80   :  { %4555 = vst [vmem:[#allocation16_spill] sm:$0xff] %v2428_v47  ;;  %4556 = vst [vmem:[#allocation17_spill] sm:$0xff] %v2430_v48  ;;  %v49_v52 = vpop.permute.xlu1 %48  ;;  %116 = vrot.lane.b32.xlu0 %v2428_v47, %s2211_s10  ;;  %122 = vrot.lane.b32.xlu1 %v2426_v46, %s2211_s10  ;;  %v51_v53 = vpop.permute.xlu0 %50 }
  0x81   :  { %4557 = vst [vmem:[#allocation18_spill] sm:$0xff] %v2432_v49  ;;  %v60_v54 = vsel %vm58_vm0, %v51_v53, %v53_v41  ;;  %v61_v55 = vsel %vm58_vm0, %v49_v52, %v51_v53  ;;  %4562 = vst [vmem:[#allocation23_spill] sm:$0xff] %v2460_v61  ;;  %v2466_v8 = vsel %vm58_vm0, %v47_v26, %v49_v52 }
  0x82   :  { %v2450_v58 = vmul.f32 %v95_v45, %v60_v54  ;;  %v2452_v59 = vmul.f32 %v1283_v50, %v61_v55  ;;  %v2454_v60 = vmul.f32 %v1287_v51, %v60_v54  ;;  %v2473_v16 = vmul.f32 %v87_v62, %v2466_v8  ;;  %4567 = vst [vmem:[#allocation28_spill] sm:$0xff] %v2527_v39  ;;  %v2573_v62 = vld [vmem:[%s4419_s4 + $0x18] sm:$0xff] }
  0x83   :  { %v2491_v24 = vmul.f32 %v91_v20, %v61_v55  ;;  %v2546_v45 = vrot.slane %v2484_v23, %v2371_v18  ;;  %v2561_v54 = vrot.slane %v2484_v23, %v2422_v44  ;;  %v2620_v9 = vrot.slane %v2573_v62, %v2352_v11 }
  0x84   :  { %4559 = vst [vmem:[#allocation20_spill] sm:$0xff] %v2450_v58  ;;  %4560 = vst [vmem:[#allocation21_spill] sm:$0xff] %v2452_v59  ;;  %120 = vrot.lane.b32.xlu0 %v2446_v56, %s2211_s10  ;;  %128 = vrot.lane.b32.xlu1 %v2450_v58, %s2211_s10  ;;  %v582_v63 = vpop.permute.xlu0 %581  ;;  %v584_v19 = vpop.permute.xlu1 %583 }
  0x85   :  { %4561 = vst [vmem:[#allocation22_spill] sm:$0xff] %v2454_v60  ;;  %4563 = vst [vmem:[#allocation24_spill] sm:$0xff] %v2473_v16  ;;  %v603_v40 = vsel %vm132_vm1, %v582_v63, %v584_v19 }
  0x86   :  { %4564 = vst [vmem:[#allocation25_spill] sm:$0xff] %v2491_v24  ;;  %v2539_v42 = vmul.f32 %v603_v40, %v2523_v35  ;;  %4573 = vst [vmem:[#allocation34_spill] sm:$0xff] %v2620_v9 }
  0x88   :  { %130 = vrot.lane.b32.xlu0 %v2460_v61, %s2211_s10  ;;  %402 = vrot.lane.b32.xlu1 %v2428_v47, %s2212_s11  ;;  %v586_v17 = vpop.permute.xlu0 %585  ;;  %v588_v26 = vpop.permute.xlu1 %587 }
  0x89   :  { %v602_v30 = vsel %vm132_vm1, %v584_v19, %v586_v17  ;;  %v601_v51 = vsel %vm132_vm1, %v586_v17, %v588_v26  ;;  %v2585_v19 = vrot.slane %v2573_v62, %v2355_v12 }
  0x8a   :  { %v2519_v34 = vmul.f32 %v602_v30, %v2508_v29  ;;  %v2557_v53 = vmul.f32 %v601_v51, %v2546_v45  ;;  %v2598_v30 = vrot.slane %v2573_v62, %v2371_v18 }
  0x8c   :  { %124 = vrot.lane.b32.xlu0 %v2473_v16, %s2211_s10  ;;  %406 = vrot.lane.b32.xlu1 %v2446_v56, %s2212_s11  ;;  %v596_v25 = vpop.permute.xlu0 %595  ;;  %v2512_v31 = vpop.permute.xlu1 %593  ;;  %4570 = vst [vmem:[#allocation31_spill] sm:$0xff] %v2598_v30 }
  0x8d   :  { %v604_v27 = vsel %vm132_vm1, %v596_v25, %v582_v63  ;;  %v597_v41 = vsel %vm132_vm1, %v2512_v31, %v596_v25 }
  0x8e   :  { %v2504_v28 = vmul.f32 %v604_v27, %v2495_v13  ;;  %v2542_v43 = vmul.f32 %v597_v41, %v2527_v39  ;;  %v2604_v41 = vrot.slane %v2573_v62, %v2368_v15 }
  0x90   :  { %404 = vrot.lane.b32.xlu0 %v2400_v33, %s2212_s11  ;;  %410 = vrot.lane.b32.xlu1 %v2473_v16, %s2212_s11  ;;  %4568 = vst [vmem:[#allocation29_spill] sm:$0xff] %v2542_v43  ;;  %v742_v50 = vpop.permute.xlu1 %741  ;;  %v2550_v52 = vpop.permute.xlu0 %589  ;;  %4571 = vst [vmem:[#allocation32_spill] sm:$0xff] %v2604_v41 }
  0x91   :  { %v600_v55 = vsel %vm132_vm1, %v588_v26, %v2550_v52 }
  0x92   :  { %v2577_v17 = vmul.f32 %v600_v55, %v2561_v54 }
  0x94   :  { %408 = vrot.lane.b32.xlu0 %v2426_v46, %s2212_s11  ;;  %412 = vrot.lane.b32.xlu1 %v2491_v24, %s2212_s11  ;;  %v746_v57 = vpop.permute.xlu1 %745  ;;  %v744_v63 = vpop.permute.xlu0 %743  ;;  %4569 = vst [vmem:[#allocation30_spill] sm:$0xff] %v2577_v17 }
  0x95   :  { %v762_v20 = vsel %vm418_vm2, %v744_v63, %v746_v57  ;;  %v763_v51 = vsel %vm418_vm2, %v742_v50, %v744_v63 }
  0x96   :  { %v2594_v27 = vmul.f32 %v762_v20, %v2585_v19  ;;  %v2616_v20 = vmul.f32 %v763_v51, %v2604_v41  ;;  %v2635_v51 = vrot.slane %v2573_v62, %v2379_v21 }
  0x98   :  { %416 = vrot.lane.b32.xlu0 %v2460_v61, %s2212_s11  ;;  %613 = vrot.lane.b32.xlu1 %v2504_v28, %s2213_s12  ;;  %v750_v25 = vpop.permute.xlu1 %749  ;;  %v748_v26 = vpop.permute.xlu0 %747  ;;  %4572 = vst [vmem:[#allocation33_spill] sm:$0xff] %v2616_v20  ;;  %4574 = vst [vmem:[#allocation35_spill] sm:$0xff] %v2635_v51 }
  0x99   :  { %v760_v40 = vsel %vm418_vm2, %v748_v26, %v750_v25 }
  0x9a   :  { %v2613_v55 = vmul.f32 %v760_v40, %v2598_v30 }
  0x9c   :  { %126 = vrot.lane.b32.xlu0 %v2491_v24, %s2211_s10  ;;  %617 = vrot.lane.b32.xlu1 %v2519_v34, %s2213_s12  ;;  %v2628_v63 = vpop.permute.xlu0 %755 }
  0x9d   :  { %v764_v24 = vsel %vm418_vm2, %v2628_v63, %v742_v50 }
  0xa0   :  { %615 = vrot.lane.b32.xlu0 %v2539_v42, %s2213_s12  ;;  %627 = vrot.lane.b32.xlu1 %v2542_v43, %s2213_s12 }
  0xa4   :  { %619 = vrot.lane.b32.xlu0 %v2557_v53, %s2213_s12  ;;  %649 = vrot.lane.b32.xlu1 %v2519_v34, %s2214_s13 }
  0xa8   :  { %647 = vrot.lane.b32.xlu0 %v2539_v42, %s2214_s13  ;;  %653 = vrot.lane.b32.xlu1 %v2577_v17, %s2214_s13 }
  0xac   :  { %651 = vrot.lane.b32.xlu0 %v2557_v53, %s2214_s13  ;;  %414 = vrot.lane.b32.xlu1 %v2450_v58, %s2212_s11  ;;  %v761_v58 = vsel %vm418_vm2, %v746_v57, %v748_v26  ;;  %v752_v57 = vpop.permute.xlu1 %751  ;;  %v2645_v26 = vmul.f32 %v764_v24, %v2635_v51  ;;  %v1279_v24 = vrot.slane %v2365_v14, %v2371_v18 }
  0xad   :  { %v2631_v40 = vmul.f32 %v761_v58, %v2620_v9  ;;  %v2649_v58 = vrot.slane %v2573_v62, %v2422_v44  ;;  %v759_v21 = vsel %vm418_vm2, %v750_v25, %v752_v57  ;;  %v2679_v44 = vrot.slane %v2484_v23, %v2382_v22 }
  0xae   :  { %4575 = vst [vmem:[#allocation36_spill] sm:$0xff] %v2645_v26  ;;  %v2671_v25 = vmul.f32 %v1279_v24, %v2466_v8  ;;  %v4438_v8 = vmov 0   ;;  %v2695_v51 = vrot.slane %v2484_v23, %v2411_v38 }
  0xaf   :  { %4576 = vst [vmem:[#allocation37_spill] sm:$0xff] %v2649_v58  ;;  %v2658_v50 = vmul.f32 %v759_v21, %v2649_v58  ;;  %v592_v21 = vpop.permute.xlu0 %591  ;;  %4579 = vst [vmem:[#allocation40_spill] sm:$0xff] %v2679_v44  ;;  %981 = vmatprep.mubr.bf16.mxu1 %v4438_v8  ;;  %940 = vmatprep.mubr.bf16.mxu0 %v4438_v8 }
  0xb0   :  { %645 = vrot.lane.b32.xlu0 %v2504_v28, %s2214_s13  ;;  %775 = vrot.lane.b32.xlu1 %v2594_v27, %s2213_s12  ;;  %4578 = vst [vmem:[#allocation39_spill] sm:$0xff] %v2671_v25  ;;  %v598_v14 = vsel %vm132_vm1, %v592_v21, %v2512_v31  ;;  %v754_v24 = vpop.permute.xlu1 %753  ;;  %4581 = vst [vmem:[#allocation42_spill] sm:$0xff] %v2695_v51  ;;  %v599_v31 = vsel %vm132_vm1, %v2550_v52, %v592_v21 }
  0xb1   :  { %4577 = vst [vmem:[#allocation38_spill] sm:$0xff] %v2658_v50  ;;  %v2691_v58 = vmul.f32 %v598_v14, %v2679_v44  ;;  %2205 = vset.pattern.permute.xlu0 %v4438_v8 }
  0xb3   :  { %4580 = vst [vmem:[#allocation41_spill] sm:$0xff] %v2691_v58  ;;  %v2714_v23 = vpop.permute.xlu0 %677 }
  0xb4   :  { %773 = vrot.lane.b32.xlu0 %v2616_v20, %s2213_s12  ;;  %779 = vrot.lane.b32.xlu1 %v2613_v55, %s2213_s12  ;;  %v2708_v14 = vpop.permute.xlu1 %679 }
  0xb7   :  { %v2722_v21 = vpop.permute.xlu0 %681 }
  0xb8   :  { %777 = vrot.lane.b32.xlu0 %v2631_v40, %s2213_s12  ;;  %805 = vrot.lane.b32.xlu1 %v2616_v20, %s2214_s13  ;;  %v2720_v52 = vpop.permute.xlu1 %683 }
  0xbb   :  { %v2734_v8 = vpop.permute.xlu0 %711 }
  0xbc   :  { %809 = vrot.lane.b32.xlu1 %v2631_v40, %s2214_s13  ;;  %787 = vrot.lane.b32.xlu0 %v2645_v26, %s2213_s12 }
  0xc0   :  { %813 = vrot.lane.b32.xlu1 %v2658_v50, %s2214_s13  ;;  %807 = vrot.lane.b32.xlu0 %v2594_v27, %s2214_s13 }
  0xc4   :  { %1314 = vrot.lane.b32.xlu1 %v2408_v37, %s2211_s10  ;;  %811 = vrot.lane.b32.xlu0 %v2613_v55, %s2214_s13 }
  0xc8   :  { %1318 = vrot.lane.b32.xlu1 %v2671_v25, %s2211_s10  ;;  %1312 = vrot.lane.b32.xlu0 %v2406_v36, %s2211_s10 }
  0xcc   :  { %621 = vrot.lane.b32.xlu1 %v2577_v17, %s2213_s12  ;;  %1316 = vrot.lane.b32.xlu0 %v2398_v32, %s2211_s10  ;;  %v2706_v17 = vmul.f32 %v599_v31, %v2695_v51  ;;  %v2728_v31 = vpop.permute.xlu1 %691 }
  0xce   :  { %4582 = vst [vmem:[#allocation43_spill] sm:$0xff] %v2706_v17 }
  0xd0   :  { %1326 = vrot.lane.b32.xlu0 %v2430_v48, %s2211_s10  ;;  %625 = vrot.lane.b32.xlu1 %v2691_v58, %s2213_s12 }
  0xd4   :  { %623 = vrot.lane.b32.xlu0 %v2706_v17, %s2213_s12  ;;  %1320 = vrot.lane.b32.xlu1 %v2452_v59, %s2211_s10 }
  0xd8   :  { %1324 = vrot.lane.b32.xlu0 %v2432_v49, %s2211_s10  ;;  %657 = vrot.lane.b32.xlu1 %v2691_v58, %s2214_s13  ;;  %v2736_v58 = vpop.permute.xlu1 %713 }
  0xdc   :  { %655 = vrot.lane.b32.xlu0 %v2706_v17, %s2214_s13  ;;  %685 = vrot.lane.b32.xlu1 %v2286_v6, %s2213_s12  ;;  %v2742_v17 = vpop.permute.xlu0 %715  ;;  %v2748_v6 = vpop.permute.xlu1 %717 }
  0xe0   :  { %659 = vrot.lane.b32.xlu0 %v2542_v43, %s2214_s13  ;;  %689 = vrot.lane.b32.xlu1 %v2279_v5, %s2213_s12  ;;  %v2754_v44 = vpop.permute.xlu0 %709 }
  0xe4   :  { %687 = vrot.lane.b32.xlu0 %v2291_v7, %s2213_s12  ;;  %721 = vrot.lane.b32.xlu1 %v2279_v5, %s2214_s13  ;;  %v2758_v5 = vrot.slane %v2573_v62, %v2411_v38 }
  0xe6   :  { %4583 = vst [vmem:[#allocation44_spill] sm:$0xff] %v2758_v5 }
  0xe8   :  { %719 = vrot.lane.b32.xlu0 %v2291_v7, %s2214_s13  ;;  %1472 = vrot.lane.b32.xlu1 %v2406_v36, %s2212_s11  ;;  %v758_v7 = vsel %vm418_vm2, %v752_v57, %v754_v24 }
  0xec   :  { %723 = vrot.lane.b32.xlu0 %v2274_v4, %s2214_s13  ;;  %1476 = vrot.lane.b32.xlu1 %v2398_v32, %s2212_s11  ;;  %v2769_v32 = vmul.f32 %v758_v7, %v2758_v5 }
  0xee   :  { %v119_v43 = vpop.permute.xlu1 %118  ;;  %4584 = vst [vmem:[#allocation45_spill] sm:$0xff] %v2769_v32 }
  0xf0   :  { %1474 = vrot.lane.b32.xlu0 %v2408_v37, %s2212_s11  ;;  %1480 = vrot.lane.b32.xlu1 %v2452_v59, %s2212_s11  ;;  %v2779_v37 = vrot.slane %v2573_v62, %v2382_v22  ;;  %v757_v59 = vsel %vm418_vm2, %v754_v24, %v2628_v63  ;;  %v2832_v22 = vld [vmem:[%s4419_s4 + $0x20] sm:$0xff] }
  0xf1   :  { %4590 = vst [vmem:[#allocation51_spill] sm:$0xff] %v2832_v22  ;;  %v2847_v51 = vrot.slane %v2832_v22, %v2368_v15 }
  0xf2   :  { %v2766_v4 = vpop.permute.xlu1 %122  ;;  %v117_v36 = vpop.permute.xlu0 %116  ;;  %4585 = vst [vmem:[#allocation46_spill] sm:$0xff] %v2779_v37  ;;  %v2791_v5 = vmul.f32 %v757_v59, %v2779_v37 }
  0xf3   :  { %v139_v9 = vsel %vm132_vm1, %v117_v36, %v119_v43 }
  0xf4   :  { %1478 = vrot.lane.b32.xlu0 %v2671_v25, %s2212_s11  ;;  %783 = vrot.lane.b32.xlu1 %v2769_v32, %s2213_s12  ;;  %4586 = vst [vmem:[#allocation47_spill] sm:$0xff] %v2791_v5 }
  0xf6   :  { %v2775_v38 = vpop.permute.xlu1 %128  ;;  %v121_v57 = vpop.permute.xlu0 %120 }
  0xf8   :  { %781 = vrot.lane.b32.xlu0 %v2658_v50, %s2213_s12  ;;  %1486 = vrot.lane.b32.xlu1 %v2430_v48, %s2212_s11 }
  0xfa   :  { %v2788_v7 = vpop.permute.xlu1 %402  ;;  %v131_v25 = vpop.permute.xlu0 %130 }
  0xfc   :  { %785 = vrot.lane.b32.xlu0 %v2791_v5, %s2213_s12  ;;  %815 = vrot.lane.b32.xlu1 %v2769_v32, %s2214_s13 }
  0xfe   :  { %v2797_v62 = vpop.permute.xlu1 %406  ;;  %v2799_v63 = vpop.permute.xlu0 %124 }
 0x100   :  { %1482 = vrot.lane.b32.xlu0 %v2454_v60, %s2212_s11  ;;  %819 = vrot.lane.b32.xlu1 %v2645_v26, %s2214_s13 }
 0x102   :  { %v2805_v24 = vpop.permute.xlu1 %410  ;;  %v2807_v59 = vpop.permute.xlu0 %404 }
 0x104   :  { %817 = vrot.lane.b32.xlu0 %v2791_v5, %s2214_s13  ;;  %340 = vrot.lane.b32.xlu1 %v2400_v33, %s2213_s12 }
 0x106   :  { %v2813_v48 = vpop.permute.xlu1 %412  ;;  %v2815_v32 = vpop.permute.xlu0 %408 }
 0x107   :  { %4587 = vst [vmem:[#allocation48_spill] sm:$0xff] %v2813_v48 }
 0x108   :  { %1322 = vrot.lane.b32.xlu0 %v2454_v60, %s2211_s10  ;;  %344 = vrot.lane.b32.xlu1 %v2426_v46, %s2213_s12  ;;  %v140_v60 = vsel %vm132_vm1, %v131_v25, %v117_v36 }
 0x10a   :  { %v614_v26 = vpop.permute.xlu1 %613  ;;  %v2821_v50 = vpop.permute.xlu0 %416 }
 0x10b   :  { %4588 = vst [vmem:[#allocation49_spill] sm:$0xff] %v2821_v50 }
 0x10c   :  { %338 = vrot.lane.b32.xlu0 %v2428_v47, %s2213_s12  ;;  %352 = vrot.lane.b32.xlu1 %v2460_v61, %s2213_s12  ;;  %v2843_v61 = vrot.slane %v2832_v22, %v2355_v12 }
 0x10e   :  { %v618_v5 = vpop.permute.xlu1 %617  ;;  %v2827_v37 = vpop.permute.xlu0 %126 }
 0x10f   :  { %4589 = vst [vmem:[#allocation50_spill] sm:$0xff] %v2827_v37  ;;  %v2850_v37 = vmul.f32 %v2495_v13, %v140_v60  ;;  %v2875_v13 = vrot.slane %v2832_v22, %v2371_v18 }
 0x110   :  { %342 = vrot.lane.b32.xlu0 %v2446_v56, %s2213_s12  ;;  %374 = vrot.lane.b32.xlu1 %v2446_v56, %s2214_s13  ;;  %v138_v56 = vsel %vm132_vm1, %v119_v43, %v121_v57  ;;  %v2871_v43 = vrot.slane %v2832_v22, %v2352_v11  ;;  %v2892_v22 = vld [vmem:[%s4419_s4 + $0x28] sm:$0xff] }
 0x112   :  { %v2852_v48 = vpop.permute.xlu1 %627  ;;  %v616_v50 = vpop.permute.xlu0 %615 }
 0x113   :  { %4591 = vst [vmem:[#allocation52_spill] sm:$0xff] %v2852_v48  ;;  %v636_v30 = vsel %vm206_vm3, %v2852_v48, %v614_v26  ;;  %v635_v20 = vsel %vm206_vm3, %v614_v26, %v616_v50  ;;  %v634_v26 = vsel %vm206_vm3, %v616_v50, %v618_v5  ;;  %v2883_v48 = vmul.f32 %v2508_v29, %v138_v56 }
 0x114   :  { %372 = vrot.lane.b32.xlu0 %v2400_v33, %s2214_s13  ;;  %190 = vrot.lane.b32.xlu1 %v2850_v37, %s2213_s12  ;;  %v638_v60 = vmul.f32 %v635_v20, %v2843_v61  ;;  %v637_v36 = vmul.f32 %v636_v30, %v2847_v51  ;;  %v2880_v33 = vmul.f32 %v2523_v35, %v139_v9 }
 0x115   :  { %4592 = vst [vmem:[#allocation53_spill] sm:$0xff] %v2883_v48  ;;  %v137_v9 = vsel %vm132_vm1, %v121_v57, %v2766_v4  ;;  %v133_v56 = vsel %vm132_vm1, %v2775_v38, %v131_v25  ;;  %v699_v25 = vsel %vm206_vm3, %v2714_v23, %v2708_v14 }
 0x116   :  { %v650_v20 = vpop.permute.xlu1 %649  ;;  %v2885_v41 = vpop.permute.xlu0 %619  ;;  %v838_v30 = vpack.c.bf16 %v2539_v42, %v638_v60  ;;  %v837_v47 = vpack.c.bf16 %v2504_v28, %v637_v36  ;;  %v639_v42 = vmul.f32 %v634_v26, %v2871_v43  ;;  %v2919_v57 = vmul.f32 %v2546_v45, %v137_v9 }
 0x117   :  { %v633_v50 = vsel %vm206_vm3, %v618_v5, %v2885_v41  ;;  %v2916_v5 = vrot.slane %v2892_v22, %v2355_v12  ;;  %v2922_v60 = vmul.f32 %v2527_v39, %v133_v56  ;;  %v698_v9 = vsel %vm206_vm3, %v2708_v14, %v2722_v21 }
 0x118   :  { %192 = vrot.lane.b32.xlu0 %v2880_v33, %s2213_s12  ;;  %194 = vrot.lane.b32.xlu1 %v2883_v48, %s2213_s12  ;;  %v640_v28 = vmul.f32 %v633_v50, %v2875_v13  ;;  %4594 = vst [vmem:[#allocation55_spill] sm:$0xff] %v2919_v57  ;;  %v2937_v56 = vrot.slane %v2892_v22, %v2371_v18 }
 0x119   :  { %908 = vmatprep.subr.bf16.mxu0 %v838_v30  ;;  %4593 = vst [vmem:[#allocation54_spill] sm:$0xff] %v2916_v5  ;;  %4595 = vst [vmem:[#allocation56_spill] sm:$0xff] %v2922_v60  ;;  %v697_v30 = vsel %vm206_vm3, %v2722_v21, %v2720_v52  ;;  %v702_v12 = vmul.f32 %v699_v25, %v2843_v61  ;;  %v728_v14 = vsel %vm280_vm4, %v2742_v17, %v2748_v6 }
 0x11a   :  { %909 = vmatpush1.bf16.msra.mxu0 %v837_v47  ;;  %v2924_v36 = vpop.permute.xlu1 %653  ;;  %v648_v26 = vpop.permute.xlu0 %647  ;;  %v840_v50 = vpack.c.bf16 %v2557_v53, %v640_v28  ;;  %4596 = vst [vmem:[#allocation57_spill] sm:$0xff] %v2937_v56  ;;  %v839_v28 = vpack.c.bf16 %v2519_v34, %v639_v42  ;;  %v703_v21 = vmul.f32 %v698_v9, %v2871_v43 }
 0x11b   :  { %v666_v47 = vsel %vm280_vm4, %v648_v26, %v650_v20  ;;  %v704_v25 = vmul.f32 %v697_v30, %v2875_v13  ;;  %v700_v34 = vsel %vm206_vm3, %v2728_v31, %v2714_v23  ;;  %v730_v42 = vsel %vm280_vm4, %v2734_v8, %v2736_v58 }
 0x11c   :  { %v670_v53 = vmul.f32 %v666_v47, %v2916_v5  ;;  %196 = vrot.lane.b32.xlu0 %v2919_v57, %s2213_s12  ;;  %204 = vrot.lane.b32.xlu1 %v2922_v60, %s2213_s12  ;;  %v2956_v47 = vrot.slane %v2892_v22, %v2352_v11  ;;  %v736_v9 = vmul.f32 %v728_v14, %v2937_v56 }
 0x11d   :  { %949 = vmatprep.subr.bf16.mxu1 %v840_v50  ;;  %v734_v11 = vmul.f32 %v730_v42, %v2916_v5 }
 0x11e   :  { %4597 = vst [vmem:[#allocation58_spill] sm:$0xff] %v2956_v47  ;;  %950 = vmatpush1.bf16.msra.mxu1 %v839_v28  ;;  %v2958_v18 = vpop.permute.xlu1 %414  ;;  %v652_v39 = vpop.permute.xlu0 %651  ;;  %v846_v29 = vpack.c.bf16 %v702_v12, %v670_v53  ;;  %v136_v12 = vsel %vm132_vm1, %v2766_v4, %v2799_v63  ;;  %v729_v28 = vsel %vm280_vm4, %v2736_v58, %v2742_v17 }
 0x11f   :  { %v664_v50 = vsel %vm280_vm4, %v652_v39, %v2924_v36  ;;  %v665_v30 = vsel %vm280_vm4, %v650_v20, %v652_v39  ;;  %v701_v39 = vmul.f32 %v700_v34, %v2847_v51  ;;  %v2991_v4 = vrot.slane %v2892_v22, %v2368_v15 }
 0x120   :  { %v671_v23 = vmul.f32 %v665_v30, %v2956_v47  ;;  %v672_v53 = vmul.f32 %v664_v50, %v2937_v56  ;;  %266 = vrot.lane.b32.xlu0 %v2880_v33, %s2214_s13  ;;  %268 = vrot.lane.b32.xlu1 %v2883_v48, %s2214_s13  ;;  %v731_v17 = vsel %vm280_vm4, %v2754_v44, %v2734_v8 }
 0x121   :  { %910 = vmatprep.subr.bf16.mxu0 %v846_v29  ;;  %4598 = vst [vmem:[#allocation59_spill] sm:$0xff] %v2991_v4  ;;  %v3001_v29 = vmul.f32 %v2561_v54, %v136_v12  ;;  %v735_v34 = vmul.f32 %v729_v28, %v2956_v47  ;;  %v733_v8 = vmul.f32 %v731_v17, %v2991_v4 }
 0x122   :  { %v776_v20 = vpop.permute.xlu1 %775  ;;  %v2993_v14 = vpop.permute.xlu0 %645  ;;  %v848_v50 = vpack.c.bf16 %v704_v25, %v672_v53  ;;  %v847_v30 = vpack.c.bf16 %v703_v21, %v671_v23  ;;  %v856_v21 = vpack.c.bf16 %v736_v9, %v2262_v2  ;;  %v854_v23 = vpack.c.bf16 %v734_v11, %v2267_v3 }
 0x123   :  { %v667_v58 = vsel %vm280_vm4, %v2993_v14, %v648_v26  ;;  %v855_v2 = vpack.c.bf16 %v735_v34, %v2250_v0  ;;  %v853_v28 = vpack.c.bf16 %v733_v8, %v2255_v1  ;;  %v424_v0 = vsel %vm418_vm2, %v2807_v59, %v2797_v62 }
 0x124   :  { %v669_v15 = vmul.f32 %v667_v58, %v2991_v4  ;;  %270 = vrot.lane.b32.xlu0 %v2919_v57, %s2214_s13  ;;  %951 = vmatprep.subr.bf16.mxu1 %v848_v50  ;;  %v425_v58 = vsel %vm418_vm2, %v2788_v7, %v2807_v59  ;;  %v3053_v34 = vmul.f32 %v2585_v19, %v424_v0  ;;  %v4601_v59 = vld [vmem:[#allocation32_spill] sm:$0xff] }
 0x125   :  { %272 = vrot.lane.b32.xlu1 %v3001_v29, %s2214_s13  ;;  %952 = vmatpush1.bf16.msra.mxu1 %v847_v30  ;;  %v422_v8 = vsel %vm418_vm2, %v2815_v32, %v2805_v24 }
 0x126   :  { %v3014_v25 = vpop.permute.xlu1 %779  ;;  %953 = vmatprep.subr.bf16.mxu1 %v856_v21  ;;  %v774_v26 = vpop.permute.xlu0 %773  ;;  %v845_v42 = vpack.c.bf16 %v701_v39, %v669_v15  ;;  %4599 = vst [vmem:[#allocation60_spill] sm:$0xff] %v3053_v34 }
 0x127   :  { %v795_v12 = vsel %vm206_vm3, %v774_v26, %v776_v20 }
 0x128   :  { %v798_v53 = vmul.f32 %v795_v12, %v2843_v61  ;;  %264 = vrot.lane.b32.xlu0 %v2850_v37, %s2214_s13  ;;  %911 = vmatpush1.bf16.msra.mxu0 %v845_v42  ;;  %v3068_v42 = vmul.f32 %v4601_v59, %v425_v58  ;;  %v4608_v58 = vld [vmem:[#allocation49_spill] sm:$0xff] }
 0x129   :  { %378 = vrot.lane.b32.xlu1 %v2473_v16, %s2214_s13  ;;  %912 = vmatprep.subr.bf16.mxu0 %v854_v23  ;;  %v4603_v23 = vld [vmem:[#allocation33_spill] sm:$0xff] }
 0x12a   :  { %954 = vmatpush1.bf16.msra.mxu1 %v855_v2  ;;  %v3025_v9 = vpop.permute.xlu1 %805  ;;  %v778_v15 = vpop.permute.xlu0 %777  ;;  %v862_v3 = vpack.c.bf16 %v2594_v27, %v798_v53  ;;  %4602 = vst [vmem:[#allocation32_spill] sm:$0xff] %v3068_v42  ;;  %v423_v2 = vsel %vm418_vm2, %v2797_v62, %v2815_v32  ;;  %v4606_v32 = vld [vmem:[#allocation34_spill] sm:$0xff] }
 0x12b   :  { %v793_v11 = vsel %vm206_vm3, %v778_v15, %v3014_v25  ;;  %v794_v39 = vsel %vm206_vm3, %v776_v20, %v778_v15  ;;  %v4604_v15 = vld [vmem:[#allocation31_spill] sm:$0xff]  ;;  %v3092_v62 = vmul.f32 %v4606_v32, %v423_v2 }
 0x12c   :  { %v799_v50 = vmul.f32 %v794_v39, %v2871_v43  ;;  %v800_v30 = vmul.f32 %v793_v11, %v2875_v13  ;;  %376 = vrot.lane.b32.xlu0 %v2426_v46, %s2214_s13  ;;  %913 = vmatpush1.bf16.msra.mxu0 %v853_v28  ;;  %v3078_v28 = vmul.f32 %v4604_v15, %v422_v8 }
 0x12d   :  { %1484 = vrot.lane.b32.xlu1 %v2432_v49, %s2212_s11  ;;  %914 = vmatprep.subr.bf16.mxu0 %v862_v3  ;;  %4607 = vst [vmem:[#allocation61_spill] sm:$0xff] %v3092_v62 }
 0x12e   :  { %v810_v1 = vpop.permute.xlu1 %809  ;;  %v3044_v27 = vpop.permute.xlu0 %787  ;;  %v864_v20 = vpack.c.bf16 %v2613_v55, %v800_v30  ;;  %v863_v17 = vpack.c.bf16 %v2631_v40, %v799_v50  ;;  %v4600_v40 = vld [vmem:[#allocation16_spill] sm:$0xff]  ;;  %4605 = vst [vmem:[#allocation33_spill] sm:$0xff] %v3078_v28 }
 0x12f   :  { %v796_v21 = vsel %vm206_vm3, %v3044_v27, %v774_v26 }
 0x130   :  { %v797_v55 = vmul.f32 %v796_v21, %v2847_v51  ;;  %370 = vrot.lane.b32.xlu0 %v4600_v40, %s2214_s13  ;;  %955 = vmatprep.subr.bf16.mxu1 %v864_v20  ;;  %v426_v21 = vsel %vm418_vm2, %v4608_v58, %v2788_v7  ;;  %v4609_v7 = vld [vmem:[#allocation35_spill] sm:$0xff]  ;;  %v4619_v40 = vld [vmem:[#allocation14_spill] sm:$0xff] }
 0x131   :  { %478 = vrot.lane.b32.xlu1 %v3053_v34, %s2213_s12  ;;  %956 = vmatpush1.bf16.msra.mxu1 %v863_v17  ;;  %v3114_v2 = vmul.f32 %v4609_v7, %v426_v21 }
 0x132   :  { %v3070_v12 = vpop.permute.xlu1 %813  ;;  %v808_v26 = vpop.permute.xlu0 %807  ;;  %v861_v53 = vpack.c.bf16 %v4603_v23, %v797_v55 }
 0x133   :  { %v826_v3 = vsel %vm280_vm4, %v808_v26, %v810_v1  ;;  %v827_v11 = vsel %vm280_vm4, %v3025_v9, %v808_v26  ;;  %4610 = vst [vmem:[#allocation49_spill] sm:$0xff] %v3114_v2 }
 0x134   :  { %v830_v39 = vmul.f32 %v826_v3, %v2916_v5  ;;  %476 = vrot.lane.b32.xlu0 %v3068_v42, %s2213_s12  ;;  %915 = vmatpush1.bf16.msra.mxu0 %v861_v53  ;;  %v829_v0 = vmul.f32 %v827_v11, %v2991_v4  ;;  %v4620_v4 = vld [vmem:[#allocation13_spill] sm:$0xff] }
 0x135   :  { %482 = vrot.lane.b32.xlu1 %v3078_v28, %s2213_s12 }
 0x136   :  { %v870_v50 = vpack.c.bf16 %v830_v39, %v830_v39  ;;  %v3094_v30 = vpop.permute.xlu1 %1314  ;;  %v812_v20 = vpop.permute.xlu0 %811  ;;  %v869_v17 = vpack.c.bf16 %v829_v0, %v829_v0  ;;  %v3123_v0 = vld [vmem:[%s4420_s2 + $0x2] sm:$0x3] }
 0x137   :  { %v824_v8 = vsel %vm280_vm4, %v812_v20, %v3070_v12  ;;  %v825_v55 = vsel %vm280_vm4, %v810_v1, %v812_v20 }
 0x138   :  { %v832_v26 = vmul.f32 %v824_v8, %v2937_v56  ;;  %480 = vrot.lane.b32.xlu0 %v3092_v62, %s2213_s12  ;;  %2173 = vmatprep.subr.msk.bf16.mxu0 %vm883_vm5, %v870_v50  ;;  %v885_v23 = vsel %vm883_vm5, %v869_v17, 0  ;;  %v831_v53 = vmul.f32 %v825_v55, %v2956_v47  ;;  %v4611_v50 = vld [vmem:[#allocation48_spill] sm:$0xff]  ;;  %v4612_v55 = vld [vmem:[#allocation37_spill] sm:$0xff] }
 0x139   :  { %508 = vrot.lane.b32.xlu1 %v3068_v42, %s2214_s13  ;;  %917 = vmatpush1.bf16.msra.mxu0 %v885_v23  ;;  %v421_v20 = vsel %vm418_vm2, %v2805_v24, %v4611_v50  ;;  %v4613_v24 = vmov 0   ;;  %v4614_v23 = vld [vmem:[#allocation50_spill] sm:$0xff]  ;;  %v4621_v56 = vld [vmem:[#allocation8_spill] sm:$0xff]  ;;  %v4622_v47 = vld [vmem:[#allocation29_spill] sm:$0xff] }
 0x13a   :  { %v872_v3 = vpack.c.bf16 %v832_v26, %v832_v26  ;;  %v3116_v1 = vpop.permute.xlu1 %1318  ;;  %v3118_v11 = vpop.permute.xlu0 %1312  ;;  %v871_v39 = vpack.c.bf16 %v831_v53, %v831_v53  ;;  %v3140_v26 = vmul.f32 %v4612_v55, %v421_v20  ;;  %v135_v53 = vsel %vm132_vm1, %v2799_v63, %v4614_v23  ;;  %v4617_v42 = vld [vmem:[#allocation42_spill] sm:$0xff] }
 0x13b   :  { %v3161_v63 = vmul.f32 %v4617_v42, %v135_v53  ;;  %v134_v32 = vsel %vm132_vm1, %v4614_v23, %v2775_v38  ;;  %v4623_v38 = vld [vmem:[#allocation40_spill] sm:$0xff] }
 0x13c   :  { %490 = vrot.lane.b32.xlu0 %v3114_v2, %s2213_s12  ;;  %2175 = vmatprep.subr.msk.bf16.mxu1 %vm883_vm5, %v872_v3  ;;  %v891_v17 = vsel %vm883_vm5, %v871_v39, 0  ;;  %v4615_v3 = vld [vmem:[#allocation7_spill] sm:$0xff] }
 0x13d   :  { %512 = vrot.lane.b32.xlu1 %v3092_v62, %s2214_s13  ;;  %958 = vmatpush1.bf16.msra.mxu1 %v891_v17  ;;  %v4616_v39 = vld [vmem:[#allocation51_spill] sm:$0xff]  ;;  %v4618_v62 = vld [vmem:[#allocation52_spill] sm:$0xff] }
 0x13e   :  { %v622_v21 = vpop.permute.xlu1 %621  ;;  %v3135_v8 = vpop.permute.xlu0 %1316  ;;  %2174 = vmatmul.mubr.msk.bf16.vlgmr.msra.gmra.mrb[0].mxu0 %vm879_vm6, %v3123_v0  ;;  %v3151_v17 = vrot.slane %v4616_v39, %v4615_v3  ;;  %v3168_v46 = vrot.slane %v4616_v39, %v4619_v40  ;;  %v3175_v7 = vrot.slane %v4616_v39, %v4620_v4  ;;  %v3179_v53 = vrot.slane %v4616_v39, %v4621_v56 }
 0x13f   :  { %1022 = vmatprep.mubr.bf16.mxu0 %v4613_v24 }
 0x140   :  { %510 = vrot.lane.b32.xlu0 %v3053_v34, %s2214_s13  ;;  %2176 = vmatmul.mubr.msk.bf16.vlgmr.msra.gmra.mrb[0].mxu1 %vm879_vm6, %v3123_v0 }
 0x141   :  { %516 = vrot.lane.b32.xlu1 %v3140_v26, %s2214_s13  ;;  %1063 = vmatprep.mubr.bf16.mxu1 %v4613_v24 }
 0x142   :  { %v626_v20 = vpop.permute.xlu1 %625  ;;  %v3158_v49 = vpop.permute.xlu0 %1326 }
 0x143   :  { %v629_v34 = vsel %vm206_vm3, %v626_v20, %v4618_v62  ;;  %v632_v62 = vsel %vm206_vm3, %v2885_v41, %v622_v21 }
 0x144   :  { %v644_v55 = vmul.f32 %v629_v34, %v3151_v17  ;;  %514 = vrot.lane.b32.xlu0 %v3078_v28, %s2214_s13  ;;  %v641_v41 = vmul.f32 %v632_v62, %v3168_v46  ;;  %v4625_v62 = vld [vmem:[#allocation43_spill] sm:$0xff] }
 0x145   :  { %200 = vrot.lane.b32.xlu1 %v3161_v63, %s2213_s12 }
 0x146   :  { %v3186_v42 = vpop.permute.xlu1 %1320  ;;  %v624_v34 = vpop.permute.xlu0 %623  ;;  %v844_v28 = vpack.c.bf16 %v4622_v47, %v644_v55  ;;  %v3205_v47 = vmul.f32 %v4623_v38, %v134_v32  ;;  %v4624_v55 = vld [vmem:[#allocation41_spill] sm:$0xff] }
 0x147   :  { %v630_v39 = vsel %vm206_vm3, %v624_v34, %v626_v20  ;;  %v631_v5 = vsel %vm206_vm3, %v622_v21, %v624_v34 }
 0x148   :  { %v642_v48 = vmul.f32 %v631_v5, %v3175_v7  ;;  %v643_v15 = vmul.f32 %v630_v39, %v3179_v53  ;;  %198 = vrot.lane.b32.xlu0 %v3001_v29, %s2213_s12  ;;  %1031 = vmatprep.subr.bf16.mxu1 %v844_v28  ;;  %v4626_v5 = vld [vmem:[#allocation30_spill] sm:$0xff]  ;;  %v3226_v39 = vrot.slane %v2892_v22, %v4619_v40 }
 0x149   :  { %274 = vrot.lane.b32.xlu1 %v3161_v63, %s2214_s13  ;;  %v841_v57 = vpack.c.bf16 %v4626_v5, %v641_v41  ;;  %v3230_v41 = vrot.slane %v2892_v22, %v4620_v4 }
 0x14a   :  { %v843_v23 = vpack.c.bf16 %v4624_v55, %v643_v15  ;;  %v658_v20 = vpop.permute.xlu1 %657  ;;  %v3208_v21 = vpop.permute.xlu0 %1324  ;;  %v842_v34 = vpack.c.bf16 %v4625_v62, %v642_v48  ;;  %v3220_v15 = vrot.slane %v2892_v22, %v4615_v3  ;;  %v4627_v48 = vld [vmem:[#allocation25_spill] sm:$0xff] }
 0x14c   :  { %202 = vrot.lane.b32.xlu0 %v3205_v47, %s2213_s12  ;;  %990 = vmatprep.subr.bf16.mxu0 %v842_v34  ;;  %v3240_v34 = vrot.slane %v2892_v22, %v4621_v56 }
 0x14d   :  { %278 = vrot.lane.b32.xlu1 %v2922_v60, %s2214_s13  ;;  %1032 = vmatpush1.bf16.msra.mxu1 %v843_v23  ;;  %v4630_v60 = vld [vmem:[#allocation44_spill] sm:$0xff] }
 0x14e   :  { %991 = vmatpush1.bf16.msra.mxu0 %v841_v57  ;;  %v686_v28 = vpop.permute.xlu1 %685  ;;  %v656_v32 = vpop.permute.xlu0 %655 }
 0x14f   :  { %v696_v23 = vsel %vm206_vm3, %v2720_v52, %v686_v28  ;;  %v662_v3 = vsel %vm280_vm4, %v656_v32, %v658_v20  ;;  %v663_v4 = vsel %vm280_vm4, %v2924_v36, %v656_v32 }
 0x150   :  { %276 = vrot.lane.b32.xlu0 %v3205_v47, %s2214_s13  ;;  %v705_v36 = vmul.f32 %v696_v23, %v3168_v46  ;;  %v674_v56 = vmul.f32 %v662_v3, %v3230_v41  ;;  %v4628_v23 = vld [vmem:[#allocation20_spill] sm:$0xff] }
 0x151   :  { %348 = vrot.lane.b32.xlu1 %v4627_v48, %s2213_s12 }
 0x152   :  { %v690_v57 = vpop.permute.xlu1 %689  ;;  %v660_v55 = vpop.permute.xlu0 %659 }
 0x153   :  { %v693_v62 = vsel %vm206_vm3, %v690_v57, %v2728_v31  ;;  %v668_v5 = vsel %vm280_vm4, %v660_v55, %v2993_v14  ;;  %v661_v22 = vsel %vm280_vm4, %v658_v20, %v660_v55  ;;  %v420_v31 = vsel %vm418_vm2, %v4611_v50, %v2958_v18 }
 0x154   :  { %v708_v52 = vmul.f32 %v693_v62, %v3151_v17  ;;  %v676_v40 = vmul.f32 %v668_v5, %v3220_v15  ;;  %346 = vrot.lane.b32.xlu0 %v2473_v16, %s2213_s12  ;;  %v673_v5 = vmul.f32 %v663_v4, %v3226_v39  ;;  %v675_v16 = vmul.f32 %v661_v22, %v3240_v34  ;;  %v4629_v4 = vld [vmem:[#allocation23_spill] sm:$0xff] }
 0x155   :  { %380 = vrot.lane.b32.xlu1 %v4627_v48, %s2214_s13 }
 0x156   :  { %v722_v14 = vpop.permute.xlu1 %721  ;;  %v688_v32 = vpop.permute.xlu0 %687  ;;  %v852_v62 = vpack.c.bf16 %v708_v52, %v676_v40 }
 0x157   :  { %v694_v20 = vsel %vm206_vm3, %v688_v32, %v690_v57  ;;  %v695_v55 = vsel %vm206_vm3, %v686_v28, %v688_v32  ;;  %v3279_v28 = vmul.f32 %v4630_v60, %v420_v31  ;;  %v2207_v31 = vld [vmem:[%s4418_s0 + $0x28] sm:$0xff] }
 0x158   :  { %v706_v48 = vmul.f32 %v695_v55, %v3175_v7  ;;  %v707_v50 = vmul.f32 %v694_v20, %v3179_v53  ;;  %350 = vrot.lane.b32.xlu0 %v4628_v23, %s2213_s12  ;;  %1033 = vmatprep.subr.bf16.mxu1 %v852_v62  ;;  %v849_v20 = vpack.c.bf16 %v705_v36, %v673_v5 }
 0x159   :  { %384 = vrot.lane.b32.xlu1 %v4629_v4, %s2214_s13  ;;  %4631 = vst [vmem:[#allocation48_spill] sm:$0xff] %v3279_v28  ;;  %v419_v5 = vsel %vm418_vm2, %v2958_v18, %v4608_v58  ;;  %v2208_v58 = vld [vmem:[%s4418_s0 + $0x30] sm:$0xff] }
 0x15a   :  { %v851_v40 = vpack.c.bf16 %v707_v50, %v675_v16  ;;  %v3276_v3 = vpop.permute.xlu1 %1472  ;;  %v720_v57 = vpop.permute.xlu0 %719  ;;  %v850_v52 = vpack.c.bf16 %v706_v48, %v674_v56  ;;  %v2206_v16 = vld [vmem:[%s4418_s0 + $0x20] sm:$0xff] }
 0x15b   :  { %v726_v22 = vsel %vm280_vm4, %v720_v57, %v722_v14  ;;  %v727_v32 = vsel %vm280_vm4, %v2748_v6, %v720_v57 }
 0x15c   :  { %v737_v62 = vmul.f32 %v727_v32, %v3226_v39  ;;  %v738_v55 = vmul.f32 %v726_v22, %v3230_v41  ;;  %382 = vrot.lane.b32.xlu0 %v4628_v23, %s2214_s13  ;;  %992 = vmatprep.subr.bf16.mxu0 %v850_v52  ;;  %v4632_v22 = vld [vmem:[#allocation46_spill] sm:$0xff] }
 0x15d   :  { %486 = vrot.lane.b32.xlu1 %v3279_v28, %s2213_s12  ;;  %1034 = vmatpush1.bf16.msra.mxu1 %v851_v40  ;;  %v3316_v18 = vmul.f32 %v4632_v22, %v419_v5  ;;  %v4635_v5 = vld [vmem:[#allocation26_spill] sm:$0xff] }
 0x15e   :  { %v857_v56 = vpack.c.bf16 %v737_v62, %v2206_v16  ;;  %993 = vmatpush1.bf16.msra.mxu0 %v849_v20  ;;  %v3295_v6 = vpop.permute.xlu1 %1476  ;;  %v724_v48 = vpop.permute.xlu0 %723  ;;  %v858_v36 = vpack.c.bf16 %v738_v55, %v2207_v31  ;;  %v2209_v20 = vld [vmem:[%s4418_s0 + $0x38] sm:$0xff]  ;;  %v1334_v55 = vsel %vm132_vm1, %v3118_v11, %v3094_v30  ;;  %v1335_v31 = vsel %vm132_vm1, %v3158_v49, %v3118_v11 }
 0x15f   :  { %v725_v50 = vsel %vm280_vm4, %v722_v14, %v724_v48  ;;  %v732_v40 = vsel %vm280_vm4, %v724_v48, %v2754_v44  ;;  %4633 = vst [vmem:[#allocation50_spill] sm:$0xff] %v3316_v18  ;;  %v3339_v48 = vmul.f32 %v1334_v55, %v2523_v35  ;;  %v1333_v11 = vsel %vm132_vm1, %v3094_v30, %v3135_v8  ;;  %v4638_v30 = vld [vmem:[#allocation27_spill] sm:$0xff] }
 0x160   :  { %v739_v57 = vmul.f32 %v725_v50, %v3240_v34  ;;  %v740_v52 = vmul.f32 %v732_v40, %v3220_v15  ;;  %484 = vrot.lane.b32.xlu0 %v3140_v26, %s2213_s12  ;;  %994 = vmatprep.subr.bf16.mxu0 %v858_v36  ;;  %v1332_v36 = vsel %vm132_vm1, %v3135_v8, %v3116_v1  ;;  %v4640_v8 = vld [vmem:[#allocation38_spill] sm:$0xff] }
 0x161   :  { %518 = vrot.lane.b32.xlu1 %v3279_v28, %s2214_s13  ;;  %4634 = vst [vmem:[#allocation51_spill] sm:$0xff] %v3339_v48  ;;  %v3354_v50 = vmul.f32 %v1335_v31, %v4635_v5 }
 0x162   :  { %v859_v14 = vpack.c.bf16 %v739_v57, %v2208_v58  ;;  %995 = vmatpush1.bf16.msra.mxu0 %v857_v56  ;;  %v3321_v44 = vpop.permute.xlu1 %1480  ;;  %v3323_v32 = vpop.permute.xlu0 %1474  ;;  %v860_v62 = vpack.c.bf16 %v740_v52, %v2209_v20  ;;  %v3363_v57 = vmul.f32 %v1332_v36, %v2546_v45  ;;  %v3377_v45 = vmul.f32 %v1333_v11, %v4638_v30  ;;  %v4641_v36 = vld [vmem:[#allocation45_spill] sm:$0xff] }
 0x163   :  { %4636 = vst [vmem:[#allocation52_spill] sm:$0xff] %v3354_v50 }
 0x164   :  { %488 = vrot.lane.b32.xlu0 %v3316_v18, %s2213_s12  ;;  %1035 = vmatprep.subr.bf16.mxu1 %v860_v62  ;;  %4637 = vst [vmem:[#allocation29_spill] sm:$0xff] %v3363_v57  ;;  %4639 = vst [vmem:[#allocation40_spill] sm:$0xff] %v3377_v45 }
 0x165   :  { %522 = vrot.lane.b32.xlu1 %v3114_v2, %s2214_s13  ;;  %1036 = vmatpush1.bf16.msra.mxu1 %v859_v14 }
 0x166   :  { %v784_v16 = vpop.permute.xlu1 %783  ;;  %v3336_v56 = vpop.permute.xlu0 %1478 }
 0x168   :  { %520 = vrot.lane.b32.xlu0 %v3316_v18, %s2214_s13 }
 0x169   :  { %1346 = vrot.lane.b32.xlu1 %v3339_v48, %s2213_s12 }
 0x16a   :  { %v3356_v35 = vpop.permute.xlu1 %1486  ;;  %v782_v40 = vpop.permute.xlu0 %781 }
 0x16b   :  { %v791_v52 = vsel %vm206_vm3, %v782_v40, %v784_v16  ;;  %v792_v58 = vsel %vm206_vm3, %v3014_v25, %v782_v40  ;;  %v1328_v25 = vsel %vm132_vm1, %v3208_v21, %v3158_v49  ;;  %v4642_v49 = vld [vmem:[#allocation28_spill] sm:$0xff] }
 0x16c   :  { %v801_v14 = vmul.f32 %v792_v58, %v3168_v46  ;;  %v802_v20 = vmul.f32 %v791_v52, %v3175_v7  ;;  %1344 = vrot.lane.b32.xlu0 %v3354_v50, %s2213_s12 }
 0x16d   :  { %1350 = vrot.lane.b32.xlu1 %v3363_v57, %s2213_s12 }
 0x16e   :  { %v865_v62 = vpack.c.bf16 %v4640_v8, %v801_v14  ;;  %v816_v55 = vpop.permute.xlu1 %815  ;;  %v786_v31 = vpop.permute.xlu0 %785  ;;  %v866_v5 = vpack.c.bf16 %v4641_v36, %v802_v20 }
 0x16f   :  { %v789_v40 = vsel %vm206_vm3, %v786_v31, %v3044_v27  ;;  %v790_v52 = vsel %vm206_vm3, %v784_v16, %v786_v31  ;;  %v823_v14 = vsel %vm280_vm4, %v3070_v12, %v816_v55  ;;  %v3400_v27 = vmul.f32 %v1328_v25, %v4642_v49  ;;  %v4644_v16 = vld [vmem:[#allocation47_spill] sm:$0xff]  ;;  %v4645_v31 = vld [vmem:[#allocation36_spill] sm:$0xff] }
 0x170   :  { %v803_v11 = vmul.f32 %v790_v52, %v3179_v53  ;;  %v804_v58 = vmul.f32 %v789_v40, %v3151_v17  ;;  %1348 = vrot.lane.b32.xlu0 %v3377_v45, %s2213_s12  ;;  %996 = vmatprep.subr.bf16.mxu0 %v866_v5  ;;  %v833_v12 = vmul.f32 %v823_v14, %v3226_v39 }
 0x171   :  { %1378 = vrot.lane.b32.xlu1 %v3339_v48, %s2214_s13  ;;  %997 = vmatpush1.bf16.msra.mxu0 %v865_v62  ;;  %4643 = vst [vmem:[#allocation41_spill] sm:$0xff] %v3400_v27  ;;  %v4654_v48 = vld [vmem:[#allocation31_spill] sm:$0xff] }
 0x172   :  { %v867_v20 = vpack.c.bf16 %v4644_v16, %v803_v11  ;;  %v820_v30 = vpop.permute.xlu1 %819  ;;  %v3403_v8 = vpop.permute.xlu0 %1482  ;;  %v868_v36 = vpack.c.bf16 %v4645_v31, %v804_v58  ;;  %v873_v14 = vpack.c.bf16 %v833_v12, %v833_v12 }
 0x173   :  { %v828_v5 = vsel %vm280_vm4, %v820_v30, %v3025_v9  ;;  %v1331_v9 = vsel %vm132_vm1, %v3116_v1, %v3186_v42 }
 0x174   :  { %v836_v40 = vmul.f32 %v828_v5, %v3220_v15  ;;  %1358 = vrot.lane.b32.xlu0 %v3400_v27, %s2213_s12  ;;  %1037 = vmatprep.subr.bf16.mxu1 %v868_v36  ;;  %v3433_v1 = vmul.f32 %v1331_v9, %v2561_v54  ;;  %v897_v5 = vsel %vm883_vm5, %v873_v14, 0 }
 0x175   :  { %1382 = vrot.lane.b32.xlu1 %v3363_v57, %s2214_s13  ;;  %1038 = vmatpush1.bf16.msra.mxu1 %v867_v20  ;;  %v4646_v20 = vld [vmem:[#allocation11_spill] sm:$0xff] }
 0x176   :  { %v876_v62 = vpack.c.bf16 %v836_v40, %v836_v40  ;;  %v3415_v25 = vpop.permute.xlu1 %340  ;;  %v818_v52 = vpop.permute.xlu0 %817  ;;  %v4647_v40 = vld [vmem:[#allocation9_spill] sm:$0xff] }
 0x177   :  { %v821_v11 = vsel %vm280_vm4, %v818_v52, %v820_v30  ;;  %v822_v58 = vsel %vm280_vm4, %v816_v55, %v818_v52  ;;  %v4648_v52 = vld [vmem:[#allocation12_spill] sm:$0xff] }
 0x178   :  { %v834_v49 = vmul.f32 %v822_v58, %v3230_v41  ;;  %v835_v16 = vmul.f32 %v821_v11, %v3240_v34  ;;  %1380 = vrot.lane.b32.xlu0 %v3377_v45, %s2214_s13  ;;  %2179 = vmatprep.subr.msk.bf16.mxu1 %vm883_vm5, %v876_v62  ;;  %v4649_v58 = vld [vmem:[#allocation39_spill] sm:$0xff] }
 0x179   :  { %1408 = vrot.lane.b32.xlu1 %v4646_v20, %s2213_s12 }
 0x17a   :  { %v874_v30 = vpack.c.bf16 %v834_v49, %v834_v49  ;;  %v875_v31 = vpack.c.bf16 %v835_v16, %v835_v16  ;;  %v3435_v36 = vpop.permute.xlu1 %344  ;;  %v3437_v55 = vpop.permute.xlu0 %1322  ;;  %v4650_v16 = vld [vmem:[#allocation17_spill] sm:$0xff] }
 0x17c   :  { %1384 = vrot.lane.b32.xlu0 %v3433_v1, %s2214_s13  ;;  %2177 = vmatprep.subr.msk.bf16.mxu0 %vm883_vm5, %v874_v30  ;;  %v903_v12 = vsel %vm883_vm5, %v875_v31, 0 }
 0x17d   :  { %1412 = vrot.lane.b32.xlu1 %v4647_v40, %s2213_s12  ;;  %999 = vmatpush1.bf16.msra.mxu0 %v897_v5  ;;  %v1493_v5 = vsel %vm418_vm2, %v3323_v32, %v3295_v6 }
 0x17e   :  { %1040 = vmatpush1.bf16.msra.mxu1 %v903_v12  ;;  %v3446_v54 = vpop.permute.xlu1 %352  ;;  %v3448_v62 = vpop.permute.xlu0 %338  ;;  %v3495_v45 = vmul.f32 %v1493_v5, %v2585_v19  ;;  %v4651_v5 = vld [vmem:[#allocation21_spill] sm:$0xff] }
 0x180   :  { %1410 = vrot.lane.b32.xlu0 %v4648_v52, %s2213_s12  ;;  %2178 = vmatmul.mubr.msk.bf16.vlgmr.msra.gmra.mrb[4].mxu0 %vm879_vm6, %v3123_v0 }
 0x181   :  { %1376 = vrot.lane.b32.xlu1 %v3354_v50, %s2214_s13  ;;  %2180 = vmatmul.mubr.msk.bf16.vlgmr.msra.gmra.mrb[4].mxu1 %vm879_vm6, %v3123_v0 }
 0x182   :  { %v3458_v9 = vpop.permute.xlu1 %374  ;;  %v343_v11 = vpop.permute.xlu0 %342  ;;  %1131 = vmatprep.mubr.bf16.mxu0 %v4613_v24  ;;  %1172 = vmatprep.mubr.bf16.mxu1 %v4613_v24 }
 0x184   :  { %1414 = vrot.lane.b32.xlu0 %v4649_v58, %s2213_s12 }
 0x185   :  { %1442 = vrot.lane.b32.xlu1 %v4648_v52, %s2214_s13 }
 0x186   :  { %v191_v14 = vpop.permute.xlu1 %190  ;;  %v3466_v49 = vpop.permute.xlu0 %372 }
 0x188   :  { %1422 = vrot.lane.b32.xlu0 %v4650_v16, %s2213_s12 }
 0x189   :  { %1446 = vrot.lane.b32.xlu1 %v4649_v58, %s2214_s13  ;;  %v1494_v58 = vsel %vm418_vm2, %v3276_v3, %v3323_v32 }
 0x18a   :  { %v195_v0 = vpop.permute.xlu1 %194  ;;  %v193_v30 = vpop.permute.xlu0 %192 }
 0x18b   :  { %v213_v31 = vsel %vm206_vm3, %v191_v14, %v193_v30  ;;  %v212_v52 = vsel %vm206_vm3, %v193_v30, %v195_v0  ;;  %v1491_v30 = vsel %vm418_vm2, %v3336_v56, %v3321_v44 }
 0x18c   :  { %v257_v12 = vmul.f32 %v2843_v61, %v213_v31  ;;  %1444 = vrot.lane.b32.xlu0 %v4647_v40, %s2214_s13  ;;  %v3528_v2 = vmul.f32 %v1491_v30, %v4654_v48  ;;  %v4657_v48 = vld [vmem:[#allocation34_spill] sm:$0xff]  ;;  %v358_v30 = vsel %vm206_vm3, %v343_v11, %v3435_v36 }
 0x18d   :  { %1440 = vrot.lane.b32.xlu1 %v4646_v20, %s2214_s13  ;;  %v258_v20 = vmul.f32 %v2871_v43, %v212_v52 }
 0x18e   :  { %v3489_v50 = vpop.permute.xlu1 %204  ;;  %v3491_v57 = vpop.permute.xlu0 %196  ;;  %v541_v31 = vpack.c.bf16 %v2880_v33, %v257_v12  ;;  %v3515_v12 = vmul.f32 %v1494_v58, %v4601_v59  ;;  %v4655_v58 = vld [vmem:[#allocation53_spill] sm:$0xff] }
 0x18f   :  { %v214_v40 = vsel %vm206_vm3, %v3489_v50, %v191_v14  ;;  %v211_v32 = vsel %vm206_vm3, %v195_v0, %v3491_v57  ;;  %v360_v14 = vsel %vm206_vm3, %v3448_v62, %v3415_v25  ;;  %v4653_v0 = vld [vmem:[#allocation55_spill] sm:$0xff]  ;;  %v542_v18 = vpack.c.bf16 %v4655_v58, %v258_v20  ;;  %v4659_v58 = vld [vmem:[#allocation57_spill] sm:$0xff] }
 0x190   :  { %v256_v33 = vmul.f32 %v2847_v51, %v214_v40  ;;  %v259_v19 = vmul.f32 %v2875_v13, %v211_v32  ;;  %1448 = vrot.lane.b32.xlu0 %v4651_v5, %s2214_s13  ;;  %1099 = vmatprep.subr.bf16.mxu0 %v541_v31  ;;  %4652 = vst [vmem:[#allocation43_spill] sm:$0xff] %v3515_v12 }
 0x191   :  { %1506 = vrot.lane.b32.xlu1 %v3495_v45, %s2213_s12  ;;  %v1492_v31 = vsel %vm418_vm2, %v3295_v6, %v3336_v56  ;;  %v4656_v6 = vld [vmem:[#allocation54_spill] sm:$0xff] }
 0x192   :  { %v540_v52 = vpack.c.bf16 %v2850_v37, %v256_v33  ;;  %v267_v40 = vpop.permute.xlu0 %266  ;;  %v543_v32 = vpack.c.bf16 %v4653_v0, %v259_v19  ;;  %v269_v59 = vpop.permute.xlu1 %268  ;;  %v363_v37 = vmul.f32 %v360_v14, %v2843_v61  ;;  %v359_v33 = vsel %vm206_vm3, %v3415_v25, %v343_v11 }
 0x193   :  { %v286_v28 = vsel %vm280_vm4, %v267_v40, %v269_v59  ;;  %v3543_v20 = vmul.f32 %v1492_v31, %v4657_v48  ;;  %v1495_v25 = vsel %vm418_vm2, %v3356_v35, %v3276_v3  ;;  %v361_v0 = vsel %vm206_vm3, %v3446_v54, %v3448_v62 }
 0x194   :  { %1504 = vrot.lane.b32.xlu0 %v3515_v12, %s2213_s12  ;;  %1100 = vmatpush1.bf16.msra.mxu0 %v540_v52  ;;  %v331_v56 = vmul.f32 %v4656_v6, %v286_v28  ;;  %v364_v11 = vmul.f32 %v359_v33, %v2871_v43  ;;  %v365_v3 = vmul.f32 %v358_v30, %v2875_v13 }
 0x195   :  { %1510 = vrot.lane.b32.xlu1 %v3528_v2, %s2213_s12  ;;  %1140 = vmatprep.subr.bf16.mxu1 %v543_v32  ;;  %v4658_v32 = vld [vmem:[#allocation58_spill] sm:$0xff] }
 0x196   :  { %1141 = vmatpush1.bf16.msra.mxu1 %v542_v18  ;;  %v271_v19 = vpop.permute.xlu0 %270  ;;  %v549_v52 = vpack.c.bf16 %v363_v37, %v331_v56  ;;  %v4660_v37 = vld [vmem:[#allocation35_spill] sm:$0xff] }
 0x197   :  { %v3552_v14 = vpop.permute.xlu1 %272  ;;  %v285_v28 = vsel %vm280_vm4, %v269_v59, %v271_v19  ;;  %v391_v59 = vsel %vm280_vm4, %v3466_v49, %v3458_v9  ;;  %v3576_v33 = vmul.f32 %v1495_v25, %v4660_v37  ;;  %v4661_v37 = vld [vmem:[#allocation59_spill] sm:$0xff] }
 0x198   :  { %v284_v18 = vsel %vm280_vm4, %v271_v19, %v3552_v14  ;;  %v332_v31 = vmul.f32 %v4658_v32, %v285_v28  ;;  %1508 = vrot.lane.b32.xlu0 %v3543_v20, %s2213_s12  ;;  %1101 = vmatprep.subr.bf16.mxu0 %v549_v52  ;;  %v362_v52 = vmul.f32 %v361_v0, %v2847_v51 }
 0x199   :  { %v333_v62 = vmul.f32 %v4659_v58, %v284_v18  ;;  %1536 = vrot.lane.b32.xlu1 %v3515_v12, %s2214_s13  ;;  %v1490_v18 = vsel %vm418_vm2, %v3321_v44, %v3403_v8  ;;  %v395_v25 = vmul.f32 %v391_v59, %v4656_v6  ;;  %v4666_v12 = vld [vmem:[#allocation42_spill] sm:$0xff] }
 0x19a   :  { %v550_v56 = vpack.c.bf16 %v364_v11, %v332_v31  ;;  %v3578_v48 = vpop.permute.xlu0 %264 }
 0x19b   :  { %v3580_v19 = vpop.permute.xlu1 %378  ;;  %v287_v30 = vsel %vm280_vm4, %v3578_v48, %v267_v40  ;;  %v551_v28 = vpack.c.bf16 %v365_v3, %v333_v62  ;;  %v4662_v3 = vld [vmem:[#allocation37_spill] sm:$0xff] }
 0x19c   :  { %v330_v11 = vmul.f32 %v4661_v37, %v287_v30  ;;  %1518 = vrot.lane.b32.xlu0 %v3576_v33, %s2213_s12  ;;  %v3597_v62 = vmul.f32 %v1490_v18, %v4662_v3  ;;  %v1330_v30 = vsel %vm132_vm1, %v3186_v42, %v3437_v55  ;;  %v4663_v18 = vld [vmem:[#allocation10_spill] sm:$0xff]  ;;  %v4665_v3 = vld [vmem:[#allocation15_spill] sm:$0xff] }
 0x19d   :  { %1540 = vrot.lane.b32.xlu1 %v3543_v20, %s2214_s13  ;;  %1142 = vmatprep.subr.bf16.mxu1 %v551_v28 }
 0x19e   :  { %v548_v40 = vpack.c.bf16 %v362_v52, %v330_v11  ;;  %1143 = vmatpush1.bf16.msra.mxu1 %v550_v56  ;;  %v377_v31 = vpop.permute.xlu0 %376  ;;  %v557_v52 = vpack.c.bf16 %v395_v25, %v4663_v18  ;;  %v4664_v11 = vld [vmem:[#allocation19_spill] sm:$0xff] }
 0x19f   :  { %v3599_v44 = vpop.permute.xlu1 %1484  ;;  %v389_v0 = vsel %vm280_vm4, %v377_v31, %v3580_v19  ;;  %v390_v59 = vsel %vm280_vm4, %v3458_v9, %v377_v31 }
 0x1a0   :  { %v396_v56 = vmul.f32 %v390_v59, %v4658_v32  ;;  %v397_v28 = vmul.f32 %v389_v0, %v4659_v58  ;;  %1538 = vrot.lane.b32.xlu0 %v3495_v45, %s2214_s13  ;;  %1102 = vmatpush1.bf16.msra.mxu0 %v548_v40  ;;  %v3623_v59 = vmul.f32 %v1330_v30, %v4666_v12  ;;  %v4667_v40 = vld [vmem:[#allocation16_spill] sm:$0xff] }
 0x1a1   :  { %1544 = vrot.lane.b32.xlu1 %v3597_v62, %s2214_s13  ;;  %1103 = vmatprep.subr.bf16.mxu0 %v557_v52  ;;  %v1329_v30 = vsel %vm132_vm1, %v3437_v55, %v3208_v21 }
 0x1a2   :  { %v558_v9 = vpack.c.bf16 %v396_v56, %v4664_v11  ;;  %v3619_v31 = vpop.permute.xlu0 %370  ;;  %v559_v42 = vpack.c.bf16 %v397_v28, %v4665_v3  ;;  %v3649_v11 = vmul.f32 %v1329_v30, %v4623_v38  ;;  %v4668_v3 = vld [vmem:[#allocation60_spill] sm:$0xff]  ;;  %v4669_v38 = vld [vmem:[#allocation61_spill] sm:$0xff] }
 0x1a3   :  { %v479_v0 = vpop.permute.xlu1 %478  ;;  %v392_v25 = vsel %vm280_vm4, %v3619_v31, %v3466_v49 }
 0x1a4   :  { %v394_v18 = vmul.f32 %v392_v25, %v4661_v37  ;;  %1542 = vrot.lane.b32.xlu0 %v3528_v2, %s2214_s13  ;;  %1144 = vmatprep.subr.bf16.mxu1 %v559_v42 }
 0x1a5   :  { %1354 = vrot.lane.b32.xlu1 %v3623_v59, %s2213_s12  ;;  %1145 = vmatpush1.bf16.msra.mxu1 %v558_v9 }
 0x1a6   :  { %v556_v56 = vpack.c.bf16 %v394_v18, %v4667_v40  ;;  %v477_v12 = vpop.permute.xlu0 %476 }
 0x1a7   :  { %v3639_v28 = vpop.permute.xlu1 %482  ;;  %v498_v49 = vsel %vm206_vm3, %v477_v12, %v479_v0 }
 0x1a8   :  { %v501_v52 = vmul.f32 %v498_v49, %v2843_v61  ;;  %1352 = vrot.lane.b32.xlu0 %v3433_v1, %s2213_s12  ;;  %1104 = vmatpush1.bf16.msra.mxu0 %v556_v56  ;;  %v4670_v49 = vld [vmem:[#allocation33_spill] sm:$0xff] }
 0x1a9   :  { %1386 = vrot.lane.b32.xlu1 %v3623_v59, %s2214_s13 }
 0x1aa   :  { %v481_v9 = vpop.permute.xlu0 %480  ;;  %v565_v21 = vpack.c.bf16 %v4668_v3, %v501_v52 }
 0x1ab   :  { %v3652_v55 = vpop.permute.xlu1 %508  ;;  %v496_v42 = vsel %vm206_vm3, %v481_v9, %v3639_v28  ;;  %v497_v25 = vsel %vm206_vm3, %v479_v0, %v481_v9 }
 0x1ac   :  { %v502_v18 = vmul.f32 %v497_v25, %v2871_v43  ;;  %v503_v40 = vmul.f32 %v496_v42, %v2875_v13  ;;  %1356 = vrot.lane.b32.xlu0 %v3649_v11, %s2213_s12  ;;  %1105 = vmatprep.subr.bf16.mxu0 %v565_v21  ;;  %v4671_v21 = vld [vmem:[#allocation22_spill] sm:$0xff]  ;;  %v4672_v42 = vld [vmem:[#allocation32_spill] sm:$0xff] }
 0x1ad   :  { %1390 = vrot.lane.b32.xlu1 %v3400_v27, %s2214_s13 }
 0x1ae   :  { %v566_v56 = vpack.c.bf16 %v4669_v38, %v502_v18  ;;  %v3666_v30 = vpop.permute.xlu0 %490  ;;  %v567_v52 = vpack.c.bf16 %v4670_v49, %v503_v40 }
 0x1af   :  { %v513_v3 = vpop.permute.xlu1 %512  ;;  %v499_v0 = vsel %vm206_vm3, %v3666_v30, %v477_v12 }
 0x1b0   :  { %v500_v9 = vmul.f32 %v499_v0, %v2847_v51  ;;  %1388 = vrot.lane.b32.xlu0 %v3649_v11, %s2214_s13  ;;  %1146 = vmatprep.subr.bf16.mxu1 %v567_v52 }
 0x1b1   :  { %1418 = vrot.lane.b32.xlu1 %v4671_v21, %s2213_s12  ;;  %1147 = vmatpush1.bf16.msra.mxu1 %v566_v56 }
 0x1b2   :  { %v564_v25 = vpack.c.bf16 %v4672_v42, %v500_v9  ;;  %v511_v18 = vpop.permute.xlu0 %510 }
 0x1b3   :  { %v3678_v38 = vpop.permute.xlu1 %516  ;;  %v529_v40 = vsel %vm280_vm4, %v511_v18, %v513_v3  ;;  %v530_v12 = vsel %vm280_vm4, %v3652_v55, %v511_v18 }
 0x1b4   :  { %v532_v49 = vmul.f32 %v530_v12, %v4661_v37  ;;  %v533_v52 = vmul.f32 %v529_v40, %v4656_v6  ;;  %1416 = vrot.lane.b32.xlu0 %v4651_v5, %s2213_s12  ;;  %1106 = vmatpush1.bf16.msra.mxu0 %v564_v25  ;;  %v1489_v40 = vsel %vm418_vm2, %v3403_v8, %v3599_v44 }
 0x1b5   :  { %1450 = vrot.lane.b32.xlu1 %v4671_v21, %s2214_s13  ;;  %v3709_v8 = vmul.f32 %v1489_v40, %v4630_v60 }
 0x1b6   :  { %v572_v56 = vpack.c.bf16 %v532_v49, %v532_v49  ;;  %v573_v0 = vpack.c.bf16 %v533_v52, %v533_v52  ;;  %v515_v9 = vpop.permute.xlu0 %514  ;;  %v4673_v49 = vld [vmem:[#allocation18_spill] sm:$0xff] }
 0x1b7   :  { %v201_v42 = vpop.permute.xlu1 %200  ;;  %v527_v27 = vsel %vm280_vm4, %v515_v9, %v3678_v38  ;;  %v528_v18 = vsel %vm280_vm4, %v513_v3, %v515_v9 }
 0x1b8   :  { %v534_v25 = vmul.f32 %v528_v18, %v4658_v32  ;;  %v535_v12 = vmul.f32 %v527_v27, %v4659_v58  ;;  %1420 = vrot.lane.b32.xlu0 %v4673_v49, %s2213_s12  ;;  %2181 = vmatprep.subr.msk.bf16.mxu0 %vm883_vm5, %v573_v0  ;;  %v1076_v52 = vsel %vm883_vm5, %v572_v56, 0  ;;  %v3719_v56 = vld [vmem:[%s4420_s2] sm:$0x3] }
 0x1b9   :  { %1454 = vrot.lane.b32.xlu1 %v4650_v16, %s2214_s13  ;;  %1108 = vmatpush1.bf16.msra.mxu0 %v1076_v52  ;;  %v1488_v52 = vsel %vm418_vm2, %v3599_v44, %v3356_v35 }
 0x1ba   :  { %v574_v3 = vpack.c.bf16 %v534_v25, %v534_v25  ;;  %v575_v9 = vpack.c.bf16 %v535_v12, %v535_v12  ;;  %v199_v5 = vpop.permute.xlu0 %198  ;;  %v3750_v35 = vmul.f32 %v1488_v52, %v4632_v22 }
 0x1bb   :  { %v275_v18 = vpop.permute.xlu1 %274  ;;  %v209_v27 = vsel %vm206_vm3, %v199_v5, %v201_v42  ;;  %v210_v0 = vsel %vm206_vm3, %v3491_v57, %v199_v5 }
 0x1bc   :  { %v260_v25 = vmul.f32 %v3168_v46, %v210_v0  ;;  %v261_v12 = vmul.f32 %v3175_v7, %v209_v27  ;;  %1452 = vrot.lane.b32.xlu0 %v4673_v49, %s2214_s13  ;;  %2183 = vmatprep.subr.msk.bf16.mxu1 %vm883_vm5, %v575_v9  ;;  %v1082_v60 = vsel %vm883_vm5, %v574_v3, 0 }
 0x1bd   :  { %1514 = vrot.lane.b32.xlu1 %v3709_v8, %s2213_s12  ;;  %1149 = vmatpush1.bf16.msra.mxu1 %v1082_v60 }
 0x1be   :  { %v544_v57 = vpack.c.bf16 %v3001_v29, %v260_v25  ;;  %v203_v5 = vpop.permute.xlu0 %202  ;;  %v545_v40 = vpack.c.bf16 %v3161_v63, %v261_v12  ;;  %2182 = vmatmul.mubr.msk.bf16.vlgmr.msra.gmra.mrb[8].mxu0 %vm879_vm6, %v3719_v56  ;;  %v283_v12 = vsel %vm280_vm4, %v3552_v14, %v275_v18 }
 0x1bf   :  { %v279_v9 = vpop.permute.xlu1 %278  ;;  %v207_v3 = vsel %vm206_vm3, %v203_v5, %v3489_v50  ;;  %v208_v27 = vsel %vm206_vm3, %v201_v42, %v203_v5  ;;  %1213 = vmatprep.mubr.bf16.mxu0 %v4613_v24  ;;  %v4674_v42 = vld [vmem:[#allocation56_spill] sm:$0xff]  ;;  %v334_v60 = vmul.f32 %v3226_v39, %v283_v12 }
 0x1c0   :  { %v262_v29 = vmul.f32 %v3179_v53, %v208_v27  ;;  %v263_v63 = vmul.f32 %v3151_v17, %v207_v3  ;;  %1512 = vrot.lane.b32.xlu0 %v3597_v62, %s2213_s12  ;;  %1181 = vmatprep.subr.bf16.mxu0 %v545_v40 }
 0x1c1   :  { %1546 = vrot.lane.b32.xlu1 %v3709_v8, %s2214_s13  ;;  %1182 = vmatpush1.bf16.msra.mxu0 %v544_v57  ;;  %v288_v57 = vsel %vm280_vm4, %v279_v9, %v3578_v48  ;;  %v1809_v48 = vld [vmem:[%s4421_s3] sm:$0xf] }
 0x1c2   :  { %v546_v50 = vpack.c.bf16 %v3205_v47, %v262_v29  ;;  %v277_v44 = vpop.permute.xlu0 %276  ;;  %v547_v0 = vpack.c.bf16 %v4674_v42, %v263_v63  ;;  %2184 = vmatmul.mubr.msk.bf16.vlgmr.msra.gmra.mrb[8].mxu1 %vm879_vm6, %v3719_v56  ;;  %v337_v29 = vmul.f32 %v3220_v15, %v288_v57 }
 0x1c3   :  { %v349_v25 = vpop.permute.xlu1 %348  ;;  %1254 = vmatprep.mubr.bf16.mxu1 %v4613_v24  ;;  %v282_v47 = vsel %vm280_vm4, %v275_v18, %v277_v44  ;;  %v281_v18 = vsel %vm280_vm4, %v277_v44, %v279_v9 }
 0x1c4   :  { %1516 = vrot.lane.b32.xlu0 %v3750_v35, %s2213_s12  ;;  %1222 = vmatprep.subr.bf16.mxu1 %v547_v0  ;;  %v335_v52 = vmul.f32 %v3230_v41, %v282_v47  ;;  %v336_v9 = vmul.f32 %v3240_v34, %v281_v18 }
 0x1c5   :  { %1550 = vrot.lane.b32.xlu1 %v3576_v33, %s2214_s13  ;;  %1223 = vmatpush1.bf16.msra.mxu1 %v546_v50 }
 0x1c6   :  { %v347_v22 = vpop.permute.xlu0 %346 }
 0x1c7   :  { %v381_v5 = vpop.permute.xlu1 %380  ;;  %v356_v14 = vsel %vm206_vm3, %v347_v22, %v349_v25  ;;  %v357_v40 = vsel %vm206_vm3, %v3435_v36, %v347_v22 }
 0x1c8   :  { %v366_v3 = vmul.f32 %v357_v40, %v3168_v46  ;;  %v367_v27 = vmul.f32 %v356_v14, %v3175_v7  ;;  %1548 = vrot.lane.b32.xlu0 %v3750_v35, %s2214_s13  ;;  %v388_v44 = vsel %vm280_vm4, %v3580_v19, %v381_v5 }
 0x1ca   :  { %v552_v63 = vpack.c.bf16 %v366_v3, %v334_v60  ;;  %v351_v36 = vpop.permute.xlu0 %350  ;;  %v553_v50 = vpack.c.bf16 %v367_v27, %v335_v52 }
 0x1cb   :  { %v385_v42 = vpop.permute.xlu1 %384  ;;  %v354_v0 = vsel %vm206_vm3, %v351_v36, %v3446_v54  ;;  %v355_v12 = vsel %vm206_vm3, %v349_v25, %v351_v36  ;;  %v398_v54 = vmul.f32 %v388_v44, %v3226_v39 }
 0x1cc   :  { %v393_v47 = vsel %vm280_vm4, %v385_v42, %v3619_v31  ;;  %v368_v22 = vmul.f32 %v355_v12, %v3179_v53  ;;  %v369_v60 = vmul.f32 %v354_v0, %v3151_v17  ;;  %1183 = vmatprep.subr.bf16.mxu0 %v553_v50  ;;  %1812 = vperm.xlu0 %2205, %v1809_v48   ;;  %v4676_v50 = vld [vmem:[#allocation24_spill] sm:$0xff] }
 0x1cd   :  { %v401_v19 = vmul.f32 %v393_v47, %v3220_v15  ;;  %1184 = vmatpush1.bf16.msra.mxu0 %v552_v63  ;;  %v4675_v63 = vld [vmem:[#allocation25_spill] sm:$0xff] }
 0x1ce   :  { %v554_v57 = vpack.c.bf16 %v368_v22, %v336_v9  ;;  %v383_v14 = vpop.permute.xlu0 %382  ;;  %v555_v40 = vpack.c.bf16 %v369_v60, %v337_v29  ;;  %v560_v9 = vpack.c.bf16 %v398_v54, %v4676_v50  ;;  %v4677_v22 = vld [vmem:[#allocation48_spill] sm:$0xff] }
 0x1cf   :  { %v487_v18 = vpop.permute.xlu1 %486  ;;  %v386_v25 = vsel %vm280_vm4, %v383_v14, %v385_v42  ;;  %v387_v31 = vsel %vm280_vm4, %v381_v5, %v383_v14  ;;  %v563_v27 = vpack.c.bf16 %v401_v19, %v4629_v4 }
 0x1d0   :  { %v399_v52 = vmul.f32 %v387_v31, %v3230_v41  ;;  %v400_v3 = vmul.f32 %v386_v25, %v3240_v34  ;;  %1224 = vmatprep.subr.bf16.mxu1 %v555_v40  ;;  %v4678_v25 = vld [vmem:[#allocation50_spill] sm:$0xff] }
 0x1d1   :  { %1225 = vmatpush1.bf16.msra.mxu1 %v554_v57 }
 0x1d2   :  { %v562_v48 = vpack.c.bf16 %v400_v3, %v4628_v23  ;;  %1226 = vmatprep.subr.bf16.mxu1 %v563_v27  ;;  %v485_v29 = vpop.permute.xlu0 %484  ;;  %v561_v36 = vpack.c.bf16 %v399_v52, %v4675_v63  ;;  %v4679_v52 = vld [vmem:[#allocation49_spill] sm:$0xff] }
 0x1d3   :  { %v519_v44 = vpop.permute.xlu1 %518  ;;  %v494_v5 = vsel %vm206_vm3, %v485_v29, %v487_v18  ;;  %v495_v42 = vsel %vm206_vm3, %v3639_v28, %v485_v29 }
 0x1d4   :  { %v504_v0 = vmul.f32 %v495_v42, %v3168_v46  ;;  %v505_v4 = vmul.f32 %v494_v5, %v3175_v7  ;;  %1185 = vmatprep.subr.bf16.mxu0 %v561_v36  ;;  %v526_v23 = vsel %vm280_vm4, %v3678_v38, %v519_v44 }
 0x1d5   :  { %1186 = vmatpush1.bf16.msra.mxu0 %v560_v9  ;;  %1227 = vmatpush1.bf16.msra.mxu1 %v562_v48  ;;  %v536_v14 = vmul.f32 %v526_v23, %v3226_v39 }
 0x1d6   :  { %v568_v12 = vpack.c.bf16 %v3140_v26, %v504_v0  ;;  %v489_v47 = vpop.permute.xlu0 %488  ;;  %v569_v60 = vpack.c.bf16 %v4677_v22, %v505_v4 }
 0x1d7   :  { %v523_v19 = vpop.permute.xlu1 %522  ;;  %v492_v28 = vsel %vm206_vm3, %v489_v47, %v3666_v30  ;;  %v493_v57 = vsel %vm206_vm3, %v487_v18, %v489_v47  ;;  %v576_v48 = vpack.c.bf16 %v536_v14, %v536_v14  ;;  %v4680_v47 = vld [vmem:[#allocation51_spill] sm:$0xff] }
 0x1d8   :  { %v531_v38 = vsel %vm280_vm4, %v523_v19, %v3652_v55  ;;  %v506_v40 = vmul.f32 %v493_v57, %v3179_v53  ;;  %v507_v26 = vmul.f32 %v492_v28, %v3151_v17  ;;  %1187 = vmatprep.subr.bf16.mxu0 %v569_v60 }
 0x1d9   :  { %v539_v54 = vmul.f32 %v531_v38, %v3220_v15  ;;  %1188 = vmatpush1.bf16.msra.mxu0 %v568_v12  ;;  %v1088_v4 = vsel %vm883_vm5, %v576_v48, 0  ;;  %v4681_v38 = vld [vmem:[#allocation40_spill] sm:$0xff] }
 0x1da   :  { %v570_v31 = vpack.c.bf16 %v4678_v25, %v506_v40  ;;  %v521_v30 = vpop.permute.xlu0 %520  ;;  %v571_v3 = vpack.c.bf16 %v4679_v52, %v507_v26 }
 0x1db   :  { %v1347_v18 = vpop.permute.xlu1 %1346  ;;  %v524_v27 = vsel %vm280_vm4, %v521_v30, %v523_v19  ;;  %v525_v55 = vsel %vm280_vm4, %v519_v44, %v521_v30  ;;  %v579_v29 = vpack.c.bf16 %v539_v54, %v539_v54  ;;  %v4682_v54 = vld [vmem:[#allocation29_spill] sm:$0xff] }
 0x1dc   :  { %v537_v63 = vmul.f32 %v525_v55, %v3230_v41  ;;  %v538_v36 = vmul.f32 %v524_v27, %v3240_v34  ;;  %1228 = vmatprep.subr.bf16.mxu1 %v571_v3 }
 0x1dd   :  { %1229 = vmatpush1.bf16.msra.mxu1 %v570_v31 }
 0x1de   :  { %v577_v50 = vpack.c.bf16 %v537_v63, %v537_v63  ;;  %v578_v9 = vpack.c.bf16 %v538_v36, %v538_v36  ;;  %2187 = vmatprep.subr.msk.bf16.mxu1 %vm883_vm5, %v579_v29  ;;  %v1345_v5 = vpop.permute.xlu0 %1344 }
 0x1df   :  { %v3845_v42 = vpop.permute.xlu1 %1350  ;;  %v1366_v0 = vsel %vm206_vm3, %v1345_v5, %v1347_v18 }
 0x1e0   :  { %v1369_v44 = vmul.f32 %v1366_v0, %v2843_v61  ;;  %2185 = vmatprep.subr.msk.bf16.mxu0 %vm883_vm5, %v577_v50  ;;  %v1094_v23 = vsel %vm883_vm5, %v578_v9, 0 }
 0x1e1   :  { %1190 = vmatpush1.bf16.msra.mxu0 %v1088_v4  ;;  %1231 = vmatpush1.bf16.msra.mxu1 %v1094_v23 }
 0x1e2   :  { %v1349_v12 = vpop.permute.xlu0 %1348  ;;  %v1569_v22 = vpack.c.bf16 %v4680_v47, %v1369_v44 }
 0x1e3   :  { %v1379_v60 = vpop.permute.xlu1 %1378  ;;  %v1364_v19 = vsel %vm206_vm3, %v1349_v12, %v3845_v42  ;;  %v1365_v28 = vsel %vm206_vm3, %v1347_v18, %v1349_v12 }
 0x1e4   :  { %v1370_v57 = vmul.f32 %v1365_v28, %v2871_v43  ;;  %v1371_v14 = vmul.f32 %v1364_v19, %v2875_v13  ;;  %1637 = vmatprep.subr.bf16.mxu0 %v1569_v22  ;;  %2188 = vmatmul.mubr.msk.bf16.vlgmr.msra.gmra.mrb[12].mxu1 %vm879_vm6, %v3719_v56 }
 0x1e5   :  { %2186 = vmatmul.mubr.msk.bf16.vlgmr.msra.gmra.mrb[12].mxu0 %vm879_vm6, %v3719_v56  ;;  %1710 = vmatprep.mubr.bf16.mxu1 %v4613_v24  ;;  %v4683_v56 = vld [vmem:[#allocation52_spill] sm:$0xff] }
 0x1e6   :  { %v1570_v40 = vpack.c.bf16 %v4681_v38, %v1370_v57  ;;  %v3867_v26 = vpop.permute.xlu0 %1358  ;;  %v1571_v25 = vpack.c.bf16 %v4682_v54, %v1371_v14  ;;  %1669 = vmatprep.mubr.bf16.mxu0 %v4613_v24 }
 0x1e7   :  { %v1383_v31 = vpop.permute.xlu1 %1382  ;;  %v1367_v30 = vsel %vm206_vm3, %v3867_v26, %v1345_v5 }
 0x1e8   :  { %v1368_v52 = vmul.f32 %v1367_v30, %v2847_v51  ;;  %1678 = vmatprep.subr.bf16.mxu1 %v1571_v25 }
 0x1e9   :  { %1679 = vmatpush1.bf16.msra.mxu1 %v1570_v40 }
 0x1ea   :  { %v1568_v3 = vpack.c.bf16 %v4683_v56, %v1368_v52  ;;  %v1381_v18 = vpop.permute.xlu0 %1380 }
 0x1eb   :  { %v1409_v27 = vpop.permute.xlu1 %1408  ;;  %v1397_v29 = vsel %vm280_vm4, %v1379_v60, %v1381_v18  ;;  %v1396_v4 = vsel %vm280_vm4, %v1381_v18, %v1383_v31 }
 0x1ec   :  { %1638 = vmatpush1.bf16.msra.mxu0 %v1568_v3  ;;  %v1401_v9 = vmul.f32 %v1397_v29, %v4656_v6  ;;  %v1402_v14 = vmul.f32 %v1396_v4, %v4658_v32 }
 0x1ee   :  { %v3876_v55 = vpop.permute.xlu0 %1384 }
 0x1ef   :  { %v1413_v48 = vpop.permute.xlu1 %1412  ;;  %v1395_v44 = vsel %vm280_vm4, %v1383_v31, %v3876_v55 }
 0x1f0   :  { %v1403_v28 = vmul.f32 %v1395_v44, %v4659_v58  ;;  %v4685_v44 = vld [vmem:[#allocation11_spill] sm:$0xff] }
 0x1f2   :  { %v1411_v63 = vpop.permute.xlu0 %1410 }
 0x1f3   :  { %v3880_v36 = vpop.permute.xlu1 %1376  ;;  %v1430_v50 = vsel %vm206_vm3, %v1409_v27, %v1411_v63  ;;  %v1429_v5 = vsel %vm206_vm3, %v1411_v63, %v1413_v48 }
 0x1f4   :  { %v1433_v0 = vmul.f32 %v1430_v50, %v2843_v61  ;;  %v1434_v47 = vmul.f32 %v1429_v5, %v2871_v43  ;;  %v1398_v38 = vsel %vm280_vm4, %v3880_v36, %v1379_v60  ;;  %v4684_v5 = vld [vmem:[#allocation12_spill] sm:$0xff] }
 0x1f5   :  { %v1400_v52 = vmul.f32 %v1398_v38, %v4661_v37  ;;  %v4687_v38 = vld [vmem:[#allocation9_spill] sm:$0xff] }
 0x1f6   :  { %v3893_v23 = vpop.permute.xlu0 %1414  ;;  %v1577_v12 = vpack.c.bf16 %v1433_v0, %v1401_v9  ;;  %v1578_v25 = vpack.c.bf16 %v1434_v47, %v1402_v14 }
 0x1f7   :  { %v1443_v22 = vpop.permute.xlu1 %1442  ;;  %v1428_v19 = vsel %vm206_vm3, %v1413_v48, %v3893_v23 }
 0x1f8   :  { %v1435_v57 = vmul.f32 %v1428_v19, %v2875_v13  ;;  %1639 = vmatprep.subr.bf16.mxu0 %v1577_v12 }
 0x1fa   :  { %v3905_v40 = vpop.permute.xlu0 %1422  ;;  %v1579_v54 = vpack.c.bf16 %v1435_v57, %v1403_v28  ;;  %v4686_v57 = vld [vmem:[#allocation39_spill] sm:$0xff] }
 0x1fb   :  { %v1447_v31 = vpop.permute.xlu1 %1446  ;;  %v1431_v30 = vsel %vm206_vm3, %v3905_v40, %v1409_v27 }
 0x1fc   :  { %v1432_v56 = vmul.f32 %v1431_v30, %v2847_v51  ;;  %1680 = vmatprep.subr.bf16.mxu1 %v1579_v54 }
 0x1fd   :  { %1681 = vmatpush1.bf16.msra.mxu1 %v1578_v25 }
 0x1fe   :  { %v1576_v3 = vpack.c.bf16 %v1432_v56, %v1400_v52  ;;  %v1445_v18 = vpop.permute.xlu0 %1444 }
 0x1ff   :  { %v3912_v48 = vpop.permute.xlu1 %1440  ;;  %v1461_v60 = vsel %vm280_vm4, %v1443_v22, %v1445_v18  ;;  %v1460_v27 = vsel %vm280_vm4, %v1445_v18, %v1447_v31 }
 0x200   :  { %v1462_v29 = vsel %vm280_vm4, %v3912_v48, %v1443_v22  ;;  %v1465_v63 = vmul.f32 %v1461_v60, %v4656_v6  ;;  %1640 = vmatpush1.bf16.msra.mxu0 %v1576_v3  ;;  %v1466_v12 = vmul.f32 %v1460_v27, %v4658_v32 }
 0x201   :  { %v1464_v50 = vmul.f32 %v1462_v29, %v4661_v37 }
 0x202   :  { %v3923_v9 = vpop.permute.xlu0 %1448  ;;  %v1585_v0 = vpack.c.bf16 %v1465_v63, %v4684_v5  ;;  %v1586_v54 = vpack.c.bf16 %v1466_v12, %v4687_v38 }
 0x203   :  { %v1584_v4 = vpack.c.bf16 %v1464_v50, %v4685_v44  ;;  %v1507_v47 = vpop.permute.xlu1 %1506  ;;  %v1459_v22 = vsel %vm280_vm4, %v1447_v31, %v3923_v9 }
 0x204   :  { %v1467_v19 = vmul.f32 %v1459_v22, %v4659_v58  ;;  %1641 = vmatprep.subr.bf16.mxu0 %v1585_v0 }
 0x205   :  { %1642 = vmatpush1.bf16.msra.mxu0 %v1584_v4 }
 0x206   :  { %v1505_v28 = vpop.permute.xlu0 %1504  ;;  %v1587_v14 = vpack.c.bf16 %v1467_v19, %v4686_v57 }
 0x207   :  { %v3934_v25 = vpop.permute.xlu1 %1510  ;;  %v1526_v30 = vsel %vm206_vm3, %v1505_v28, %v1507_v47 }
 0x208   :  { %v1529_v52 = vmul.f32 %v1526_v30, %v2843_v61  ;;  %1682 = vmatprep.subr.bf16.mxu1 %v1587_v14 }
 0x209   :  { %1683 = vmatpush1.bf16.msra.mxu1 %v1586_v54 }
 0x20a   :  { %v1509_v56 = vpop.permute.xlu0 %1508  ;;  %v1593_v31 = vpack.c.bf16 %v3495_v45, %v1529_v52 }
 0x20b   :  { %v3940_v3 = vpop.permute.xlu1 %1536  ;;  %v1524_v18 = vsel %vm206_vm3, %v1509_v56, %v3934_v25  ;;  %v1525_v60 = vsel %vm206_vm3, %v1507_v47, %v1509_v56 }
 0x20c   :  { %v1530_v29 = vmul.f32 %v1525_v60, %v2871_v43  ;;  %v1531_v27 = vmul.f32 %v1524_v18, %v2875_v13  ;;  %1643 = vmatprep.subr.bf16.mxu0 %v1593_v31  ;;  %v4688_v43 = vld [vmem:[#allocation43_spill] sm:$0xff] }
 0x20e   :  { %v1594_v61 = vpack.c.bf16 %v3543_v20, %v1530_v29  ;;  %v3950_v63 = vpop.permute.xlu0 %1518  ;;  %v1595_v45 = vpack.c.bf16 %v3528_v2, %v1531_v27  ;;  %v3987_v27 = vld [vmem:[%s4420_s2 + $0x4] sm:$0x3] }
 0x20f   :  { %v1541_v50 = vpop.permute.xlu1 %1540  ;;  %v1527_v5 = vsel %vm206_vm3, %v3950_v63, %v1505_v28 }
 0x210   :  { %v1528_v0 = vmul.f32 %v1527_v5, %v2847_v51  ;;  %1684 = vmatprep.subr.bf16.mxu1 %v1595_v45 }
 0x211   :  { %1685 = vmatpush1.bf16.msra.mxu1 %v1594_v61  ;;  %v3957_v44 = vpop.f32.mrb[0].mxu0 }
 0x212   :  { %v1592_v13 = vpack.c.bf16 %v4688_v43, %v1528_v0  ;;  %v1539_v4 = vpop.permute.xlu0 %1538  ;;  %v3960_v12 = vpop.f32.mrb[1].mxu0 }
 0x213   :  { %v3962_v20 = vpop.permute.xlu1 %1544  ;;  %v1557_v2 = vsel %vm280_vm4, %v1539_v4, %v1541_v50  ;;  %v1558_v47 = vsel %vm280_vm4, %v3940_v3, %v1539_v4  ;;  %v3969_v22 = vpop.f32.mrb[0].mxu1 }
 0x214   :  { %v1560_v51 = vmul.f32 %v1558_v47, %v4661_v37  ;;  %v1561_v19 = vmul.f32 %v1557_v2, %v4656_v6  ;;  %1644 = vmatpush1.bf16.msra.mxu0 %v1592_v13  ;;  %v3973_v28 = vpop.f32.mrb[1].mxu1  ;;  %v946_v57 = vpop.f32.mrb[2].mxu0 }
 0x215   :  { %v987_v14 = vpop.f32.mrb[2].mxu1  ;;  %v947_v38 = vpop.f32.mrb[3].mxu0 }
 0x216   :  { %v1600_v54 = vpack.c.bf16 %v1560_v51, %v1560_v51  ;;  %v1601_v30 = vpack.c.bf16 %v1561_v19, %v1561_v19  ;;  %v1543_v52 = vpop.permute.xlu0 %1542  ;;  %v988_v56 = vpop.f32.mrb[3].mxu1  ;;  %v4689_v38 = vld [vmem:[#allocation41_spill] sm:$0xff] }
 0x217   :  { %v1355_v31 = vpop.permute.xlu1 %1354  ;;  %v1555_v18 = vsel %vm280_vm4, %v1543_v52, %v3962_v20  ;;  %v1556_v37 = vsel %vm280_vm4, %v1541_v50, %v1543_v52 }
 0x218   :  { %v1562_v6 = vmul.f32 %v1556_v37, %v4658_v32  ;;  %v1563_v60 = vmul.f32 %v1555_v18, %v4659_v58  ;;  %2190 = vmatprep.subr.msk.bf16.mxu0 %vm883_vm5, %v1601_v30  ;;  %v1614_v29 = vsel %vm883_vm5, %v1600_v54, 0 }
 0x219   :  { %1646 = vmatpush1.bf16.msra.mxu0 %v1614_v29 }
 0x21a   :  { %v1602_v61 = vpack.c.bf16 %v1562_v6, %v1562_v6  ;;  %v1603_v45 = vpack.c.bf16 %v1563_v60, %v1563_v60  ;;  %v1353_v5 = vpop.permute.xlu0 %1352 }
 0x21b   :  { %v1387_v0 = vpop.permute.xlu1 %1386  ;;  %v1362_v50 = vsel %vm206_vm3, %v1353_v5, %v1355_v31  ;;  %v1363_v32 = vsel %vm206_vm3, %v3845_v42, %v1353_v5 }
 0x21c   :  { %v1372_v58 = vmul.f32 %v1363_v32, %v3168_v46  ;;  %v1373_v43 = vmul.f32 %v1362_v50, %v3175_v7  ;;  %2191 = vmatmul.mubr.msk.bf16.vlgmr.msra.gmra.mrb[16].mxu0 %vm879_vm6, %v3987_v27  ;;  %2192 = vmatprep.subr.msk.bf16.mxu1 %vm883_vm5, %v1603_v45  ;;  %v1620_v13 = vsel %vm883_vm5, %v1602_v61, 0  ;;  %v1394_v30 = vsel %vm280_vm4, %v3876_v55, %v1387_v0 }
 0x21d   :  { %1687 = vmatpush1.bf16.msra.mxu1 %v1620_v13  ;;  %1751 = vmatprep.mubr.bf16.mxu0 %v4613_v24 }
 0x21e   :  { %v1572_v4 = vpack.c.bf16 %v3433_v1, %v1372_v58  ;;  %v1357_v2 = vpop.permute.xlu0 %1356  ;;  %v1573_v47 = vpack.c.bf16 %v3623_v59, %v1373_v43 }
 0x21f   :  { %v1391_v42 = vpop.permute.xlu1 %1390  ;;  %v1360_v51 = vsel %vm206_vm3, %v1357_v2, %v3867_v26  ;;  %v1361_v19 = vsel %vm206_vm3, %v1355_v31, %v1357_v2  ;;  %v1404_v31 = vmul.f32 %v1394_v30, %v3226_v39 }
 0x220   :  { %v1374_v57 = vmul.f32 %v1361_v19, %v3179_v53  ;;  %v1375_v14 = vmul.f32 %v1360_v51, %v3151_v17  ;;  %2193 = vmatmul.mubr.msk.bf16.vlgmr.msra.gmra.mrb[16].mxu1 %vm879_vm6, %v3987_v27  ;;  %1719 = vmatprep.subr.bf16.mxu0 %v1573_v47 }
 0x221   :  { %1720 = vmatpush1.bf16.msra.mxu0 %v1572_v4  ;;  %1792 = vmatprep.mubr.bf16.mxu1 %v4613_v24  ;;  %v1399_v24 = vsel %vm280_vm4, %v1391_v42, %v3880_v36 }
 0x222   :  { %v1574_v1 = vpack.c.bf16 %v3649_v11, %v1374_v57  ;;  %v1389_v59 = vpop.permute.xlu0 %1388  ;;  %v1575_v54 = vpack.c.bf16 %v4689_v38, %v1375_v14  ;;  %v1407_v5 = vmul.f32 %v1399_v24, %v3220_v15 }
 0x223   :  { %v1419_v26 = vpop.permute.xlu1 %1418  ;;  %v1393_v52 = vsel %vm280_vm4, %v1387_v0, %v1389_v59  ;;  %v1392_v37 = vsel %vm280_vm4, %v1389_v59, %v1391_v42 }
 0x224   :  { %1760 = vmatprep.subr.bf16.mxu1 %v1575_v54  ;;  %v1405_v6 = vmul.f32 %v1393_v52, %v3230_v41  ;;  %v1406_v0 = vmul.f32 %v1392_v37, %v3240_v34 }
 0x225   :  { %1761 = vmatpush1.bf16.msra.mxu1 %v1574_v1 }
 0x226   :  { %v1417_v56 = vpop.permute.xlu0 %1416 }
 0x227   :  { %v1451_v11 = vpop.permute.xlu1 %1450  ;;  %v1426_v18 = vsel %vm206_vm3, %v1417_v56, %v1419_v26  ;;  %v1427_v55 = vsel %vm206_vm3, %v3893_v23, %v1417_v56 }
 0x228   :  { %v1436_v60 = vmul.f32 %v1427_v55, %v3168_v46  ;;  %v1437_v29 = vmul.f32 %v1426_v18, %v3175_v7  ;;  %v1458_v58 = vsel %vm280_vm4, %v3923_v9, %v1451_v11 }
 0x229   :  { %v1468_v51 = vmul.f32 %v1458_v58, %v3226_v39 }
 0x22a   :  { %v1580_v61 = vpack.c.bf16 %v1436_v60, %v1404_v31  ;;  %v1421_v45 = vpop.permute.xlu0 %1420  ;;  %v1581_v36 = vpack.c.bf16 %v1437_v29, %v1405_v6 }
 0x22b   :  { %v1455_v50 = vpop.permute.xlu1 %1454  ;;  %v1424_v23 = vsel %vm206_vm3, %v1421_v45, %v3905_v40  ;;  %v1425_v32 = vsel %vm206_vm3, %v1419_v26, %v1421_v45  ;;  %v4690_v26 = vld [vmem:[#allocation21_spill] sm:$0xff] }
 0x22c   :  { %v1463_v43 = vsel %vm280_vm4, %v1455_v50, %v3912_v48  ;;  %v1438_v13 = vmul.f32 %v1425_v32, %v3179_v53  ;;  %v1439_v4 = vmul.f32 %v1424_v23, %v3151_v17  ;;  %1721 = vmatprep.subr.bf16.mxu0 %v1581_v36  ;;  %v1588_v30 = vpack.c.bf16 %v1468_v51, %v4690_v26 }
 0x22d   :  { %v1471_v2 = vmul.f32 %v1463_v43, %v3220_v15  ;;  %1722 = vmatpush1.bf16.msra.mxu0 %v1580_v61 }
 0x22e   :  { %v1582_v40 = vpack.c.bf16 %v1438_v13, %v1406_v0  ;;  %v1453_v47 = vpop.permute.xlu0 %1452  ;;  %v1583_v42 = vpack.c.bf16 %v1439_v4, %v1407_v5 }
 0x22f   :  { %v1515_v19 = vpop.permute.xlu1 %1514  ;;  %v1456_v9 = vsel %vm280_vm4, %v1453_v47, %v1455_v50  ;;  %v1457_v48 = vsel %vm280_vm4, %v1451_v11, %v1453_v47  ;;  %v1591_v1 = vpack.c.bf16 %v1471_v2, %v4650_v16 }
 0x230   :  { %v1469_v57 = vmul.f32 %v1457_v48, %v3230_v41  ;;  %v1470_v14 = vmul.f32 %v1456_v9, %v3240_v34  ;;  %1762 = vmatprep.subr.bf16.mxu1 %v1583_v42 }
 0x231   :  { %1763 = vmatpush1.bf16.msra.mxu1 %v1582_v40 }
 0x232   :  { %v1590_v59 = vpack.c.bf16 %v1470_v14, %v4673_v49  ;;  %1764 = vmatprep.subr.bf16.mxu1 %v1591_v1  ;;  %v1513_v38 = vpop.permute.xlu0 %1512  ;;  %v1589_v54 = vpack.c.bf16 %v1469_v57, %v4671_v21 }
 0x233   :  { %v1547_v52 = vpop.permute.xlu1 %1546  ;;  %v1522_v56 = vsel %vm206_vm3, %v1513_v38, %v1515_v19  ;;  %v1523_v31 = vsel %vm206_vm3, %v3934_v25, %v1513_v38 }
 0x234   :  { %v1532_v24 = vmul.f32 %v1523_v31, %v3168_v46  ;;  %v1533_v16 = vmul.f32 %v1522_v56, %v3175_v7  ;;  %1723 = vmatprep.subr.bf16.mxu0 %v1589_v54  ;;  %v1554_v49 = vsel %vm280_vm4, %v3962_v20, %v1547_v52 }
 0x235   :  { %1724 = vmatpush1.bf16.msra.mxu0 %v1588_v30  ;;  %1765 = vmatpush1.bf16.msra.mxu1 %v1590_v59  ;;  %v1564_v7 = vmul.f32 %v1554_v49, %v3226_v39 }
 0x236   :  { %v1596_v21 = vpack.c.bf16 %v3597_v62, %v1532_v24  ;;  %v1517_v11 = vpop.permute.xlu0 %1516  ;;  %v1597_v18 = vpack.c.bf16 %v3709_v8, %v1533_v16 }
 0x237   :  { %v1551_v55 = vpop.permute.xlu1 %1550  ;;  %v1520_v25 = vsel %vm206_vm3, %v1517_v11, %v3950_v63  ;;  %v1521_v46 = vsel %vm206_vm3, %v1515_v19, %v1517_v11 }
 0x238   :  { %v1559_v20 = vsel %vm280_vm4, %v1551_v55, %v3940_v3  ;;  %v1534_v37 = vmul.f32 %v1521_v46, %v3179_v53  ;;  %v1535_v62 = vmul.f32 %v1520_v25, %v3151_v17  ;;  %1725 = vmatprep.subr.bf16.mxu0 %v1597_v18  ;;  %v1604_v3 = vpack.c.bf16 %v1564_v7, %v1564_v7 }
 0x239   :  { %v1567_v8 = vmul.f32 %v1559_v20, %v3220_v15  ;;  %1726 = vmatpush1.bf16.msra.mxu0 %v1596_v21 }
 0x23a   :  { %v1598_v6 = vpack.c.bf16 %v3750_v35, %v1534_v37  ;;  %v1549_v63 = vpop.permute.xlu0 %1548  ;;  %v1599_v60 = vpack.c.bf16 %v3576_v33, %v1535_v62  ;;  %v1626_v33 = vsel %vm883_vm5, %v1604_v3, 0 }
 0x23b   :  { %v1552_v39 = vsel %vm280_vm4, %v1549_v63, %v1551_v55  ;;  %v1553_v29 = vsel %vm280_vm4, %v1547_v52, %v1549_v63  ;;  %v1607_v61 = vpack.c.bf16 %v1567_v8, %v1567_v8 }
 0x23c   :  { %v1565_v53 = vmul.f32 %v1553_v29, %v3230_v41  ;;  %v1566_v17 = vmul.f32 %v1552_v39, %v3240_v34  ;;  %1766 = vmatprep.subr.bf16.mxu1 %v1599_v60 }
 0x23d   :  { %1767 = vmatpush1.bf16.msra.mxu1 %v1598_v6 }
 0x23e   :  { %v1605_v15 = vpack.c.bf16 %v1565_v53, %v1565_v53  ;;  %v1606_v45 = vpack.c.bf16 %v1566_v17, %v1566_v17  ;;  %2196 = vmatprep.subr.msk.bf16.mxu1 %vm883_vm5, %v1607_v61  ;;  %v4691_v61 = vld [vmem:[#allocation2_spill] sm:$0xff] }
 0x240   :  { %2194 = vmatprep.subr.msk.bf16.mxu0 %vm883_vm5, %v1605_v15  ;;  %v1632_v35 = vsel %vm883_vm5, %v1606_v45, 0 }
 0x241   :  { %1728 = vmatpush1.bf16.msra.mxu0 %v1626_v33  ;;  %1769 = vmatpush1.bf16.msra.mxu1 %v1632_v35 }
 0x244   :  { %2195 = vmatmul.mubr.msk.bf16.vlgmr.msra.gmra.mrb[20].mxu0 %vm879_vm6, %v3987_v27  ;;  %2197 = vmatmul.mubr.msk.bf16.vlgmr.msra.gmra.mrb[20].mxu1 %vm879_vm6, %v3987_v27 }
 0x24b   :  { %v1813_v56 = vpop.permute.xlu0 %1812 }
 0x253   :  { %v1024_v10 = vpop.f32.mrb[4].mxu0 }
 0x254   :  { %v1065_v41 = vpop.f32.mrb[4].mxu1  ;;  %v1026_v34 = vpop.f32.mrb[5].mxu0 }
 0x255   :  { %v1067_v36 = vpop.f32.mrb[5].mxu1  ;;  %v1028_v5 = vpop.f32.mrb[6].mxu0 }
 0x256   :  { %v1069_v0 = vpop.f32.mrb[6].mxu1  ;;  %v1029_v50 = vpop.f32.mrb[7].mxu0 }
 0x257   :  { %v1070_v23 = vpop.f32.mrb[7].mxu1 }
 0x291   :  { %v1133_v32 = vpop.f32.mrb[8].mxu0 }
 0x292   :  { %v1134_v58 = vadd.f32 %v1133_v32, %v3957_v44  ;;  %v1135_v43 = vpop.f32.mrb[9].mxu0 }
 0x293   :  { %v1136_v13 = vadd.f32 %v1135_v43, %v3960_v12  ;;  %v1137_v4 = vpop.f32.mrb[10].mxu0 }
 0x294   :  { %v1138_v2 = vpop.f32.mrb[11].mxu0 }
 0x295   :  { %v1174_v40 = vpop.f32.mrb[8].mxu1 }
 0x296   :  { %v1175_v47 = vadd.f32 %v1174_v40, %v3969_v22  ;;  %v1176_v27 = vpop.f32.mrb[9].mxu1 }
 0x297   :  { %v1177_v42 = vadd.f32 %v1176_v27, %v3973_v28  ;;  %v1178_v51 = vpop.f32.mrb[10].mxu1  ;;  %v2216_v28 = vmov 1966171168  }
 0x298   :  { %v1179_v19 = vpop.f32.mrb[11].mxu1  ;;  %v1876_v16 = vunpack.c.l.s4 %v2216_v28 }
 0x29a   :  { %v1877_v62 = vunpack.c.0.s8 %v1876_v16  ;;  %v4694_v16 = vld [vmem:[#allocation3_spill] sm:$0xff] }
 0x29c   :  { %v1880_v53 = vsub.s32 %v1877_v62, %v4691_v61  ;;  %v1834_v61 = vld [vmem:[%s4422_s1 + $0x18] sm:$0xff] }
 0x2b7   :  { %v1256_v9 = vpop.f32.mrb[12].mxu1 }
 0x2b8   :  { %v1215_v48 = vpop.f32.mrb[12].mxu0  ;;  %v1257_v57 = vadd.f32 %v1256_v9, %v1065_v41  ;;  %v1258_v14 = vpop.f32.mrb[13].mxu1 }
 0x2b9   :  { %v1216_v1 = vadd.f32 %v1215_v48, %v1024_v10  ;;  %v1217_v59 = vpop.f32.mrb[13].mxu0  ;;  %v1259_v44 = vadd.f32 %v1258_v14, %v1067_v36  ;;  %v1260_v38 = vpop.f32.mrb[14].mxu1 }
 0x2ba   :  { %v1218_v54 = vadd.f32 %v1217_v59, %v1026_v34  ;;  %v1219_v12 = vpop.f32.mrb[14].mxu0  ;;  %v1261_v26 = vpop.f32.mrb[15].mxu1 }
 0x2bb   :  { %v1220_v30 = vpop.f32.mrb[15].mxu0 }
 0x2ef   :  { %v1671_v52 = vpop.f32.mrb[16].mxu0 }
 0x2f0   :  { %v1801_v22 = vadd.f32 %v1671_v52, %v1134_v58  ;;  %v1673_v31 = vpop.f32.mrb[17].mxu0 }
 0x2f1   :  { %v1802_v24 = vadd.f32 %v1673_v31, %v1136_v13  ;;  %v1675_v49 = vpop.f32.mrb[18].mxu0 }
 0x2f2   :  { %v1815_v21 = vadd.f32 %v1813_v56, %v1801_v22  ;;  %v1676_v11 = vpop.f32.mrb[19].mxu0  ;;  %v4692_v22 = vld [vmem:[#allocation5_spill] sm:$0xff] }
 0x2f3   :  { %v1712_v18 = vpop.f32.mrb[16].mxu1  ;;  %v1816_v55 = vadd.f32 %v1813_v56, %v1802_v24  ;;  %v4693_v24 = vld [vmem:[#allocation4_spill] sm:$0xff] }
 0x2f4   :  { %v1803_v25 = vadd.f32 %v1712_v18, %v1175_v47  ;;  %v1714_v46 = vpop.f32.mrb[17].mxu1  ;;  %v1823_v7 = vmax.f32 %v1815_v21, 0.0  ;;  %v4695_v21 = vld [vmem:[#allocation6_spill] sm:$0xff] }
 0x2f5   :  { %v1804_v20 = vadd.f32 %v1714_v46, %v1177_v42  ;;  %v1824_v37 = vmax.f32 %v1816_v55, 0.0  ;;  %v1716_v8 = vpop.f32.mrb[18].mxu1  ;;  %v4696_v18 = vld [vmem:[#allocation14_spill] sm:$0xff] }
 0x2f6   :  { %v1817_v6 = vadd.f32 %v1813_v56, %v1803_v25  ;;  %v1717_v63 = vpop.f32.mrb[19].mxu1  ;;  %v4697_v25 = vld [vmem:[#allocation13_spill] sm:$0xff] }
 0x2f7   :  { %v1818_v60 = vadd.f32 %v1813_v56, %v1804_v20  ;;  %v1871_v39 = vcombine.low %v1823_v7, %v1824_v37  ;;  %v4698_v7 = vld [vmem:[#allocation8_spill] sm:$0xff]  ;;  %v4699_v37 = vld [vmem:[#allocation7_spill] sm:$0xff] }
 0x2f8   :  { %v1825_v29 = vmax.f32 %v1817_v6, 0.0 }
 0x2f9   :  { %v1826_v3 = vmax.f32 %v1818_v60, 0.0  ;;  %v1881_v15 = vrot.slane %v1871_v39, %v1880_v53  ;;  %v1831_v39 = vld [vmem:[%s4422_s1] sm:$0xff] }
 0x2fb   :  { %v1872_v17 = vcombine.low %v1825_v29, %v1826_v3  ;;  %v1832_v29 = vld [vmem:[%s4422_s1 + $0x8] sm:$0xff]  ;;  %v1833_v3 = vld [vmem:[%s4422_s1 + $0x10] sm:$0xff] }
 0x2fd   :  { %v1888_v45 = vrot.slane %v1872_v17, %v1880_v53 }
 0x2ff   :  { %v1903_v33 = vcombine.low %v1881_v15, %v1888_v45  ;;  %v1904_v35 = vcombine.high %v1881_v15, %v1888_v45 }
 0x301   :  { %v1913_v38 = vrot.slane %v1903_v33, %v1880_v53  ;;  %v1835_v33 = vld [vmem:[%s4422_s1 + $0x20] sm:$0xff] }
 0x317   :  { %v1753_v10 = vpop.f32.mrb[20].mxu0  ;;  %v1794_v41 = vpop.f32.mrb[20].mxu1 }
 0x318   :  { %v1805_v34 = vadd.f32 %v1753_v10, %v1216_v1  ;;  %v1807_v36 = vadd.f32 %v1794_v41, %v1257_v57  ;;  %v1755_v5 = vpop.f32.mrb[21].mxu0  ;;  %v1796_v0 = vpop.f32.mrb[21].mxu1  ;;  %v1837_v10 = vld [vmem:[%s4422_s1 + $0x30] sm:$0xff]  ;;  %v1838_v41 = vld [vmem:[%s4422_s1 + $0x38] sm:$0xff] }
 0x319   :  { %v1806_v50 = vadd.f32 %v1755_v5, %v1218_v54  ;;  %v1808_v23 = vadd.f32 %v1796_v0, %v1259_v44  ;;  %v1757_v32 = vpop.f32.mrb[22].mxu0  ;;  %v1798_v58 = vpop.f32.mrb[22].mxu1  ;;  %v1920_v44 = vrot.slane %v1904_v35, %v1880_v53  ;;  %v1836_v35 = vld [vmem:[%s4422_s1 + $0x28] sm:$0xff] }
 0x31a   :  { %v1819_v43 = vadd.f32 %v1813_v56, %v1805_v34  ;;  %v1821_v13 = vadd.f32 %v1813_v56, %v1807_v36  ;;  %v1758_v4 = vpop.f32.mrb[23].mxu0  ;;  %v1799_v2 = vpop.f32.mrb[23].mxu1  ;;  %v1841_v32 = vld [vmem:[%s4422_s1 + $0x50] sm:$0xff] }
 0x31b   :  { %v1820_v40 = vadd.f32 %v1813_v56, %v1806_v50  ;;  %v1822_v47 = vadd.f32 %v1813_v56, %v1808_v23  ;;  %v1839_v50 = vld [vmem:[%s4422_s1 + $0x40] sm:$0xff]  ;;  %v1840_v23 = vld [vmem:[%s4422_s1 + $0x48] sm:$0xff]  ;;  %v1842_v2 = vld [vmem:[%s4422_s1 + $0x58] sm:$0xff] }
 0x31c   :  { %v1827_v27 = vmax.f32 %v1819_v43, 0.0  ;;  %v1829_v42 = vmax.f32 %v1821_v13, 0.0 }
 0x31d   :  { %v1828_v51 = vmax.f32 %v1820_v40, 0.0  ;;  %v1830_v19 = vmax.f32 %v1822_v47, 0.0  ;;  %v1843_v40 = vld [vmem:[%s4422_s1 + $0x60] sm:$0xff]  ;;  %v1844_v47 = vld [vmem:[%s4422_s1 + $0x68] sm:$0xff] }
 0x31f   :  { %v1873_v9 = vcombine.low %v1827_v27, %v1828_v51  ;;  %v1874_v48 = vcombine.low %v1829_v42, %v1830_v19  ;;  %v1853_v19 = vld [vmem:[%s4422_s1 + $0xb0] sm:$0xff] }
 0x321   :  { %v1895_v14 = vrot.slane %v1873_v9, %v1880_v53  ;;  %v1902_v57 = vrot.slane %v1874_v48, %v1880_v53  ;;  %v1845_v9 = vld [vmem:[%s4422_s1 + $0x70] sm:$0xff]  ;;  %v1846_v48 = vld [vmem:[%s4422_s1 + $0x78] sm:$0xff] }
 0x323   :  { %v1905_v1 = vcombine.low %v1895_v14, %v1902_v57  ;;  %v1906_v59 = vcombine.high %v1895_v14, %v1902_v57  ;;  %v1847_v14 = vld [vmem:[%s4422_s1 + $0x80] sm:$0xff] }
 0x325   :  { %v1927_v54 = vrot.slane %v1905_v1, %v1880_v53  ;;  %v1934_v12 = vrot.slane %v1906_v59, %v1880_v53  ;;  %v1852_v59 = vld [vmem:[%s4422_s1 + $0xa8] sm:$0xff] }
 0x327   :  { %v4106_v26 = vcombine.low %v1913_v38, %v1927_v54  ;;  %v4108_v30 = vcombine.high %v1913_v38, %v1927_v54  ;;  %v4110_v52 = vcombine.low %v1920_v44, %v1934_v12  ;;  %v4112_v56 = vcombine.high %v1920_v44, %v1934_v12  ;;  %v1848_v44 = vld [vmem:[%s4422_s1 + $0x88] sm:$0xff]  ;;  %v1849_v54 = vld [vmem:[%s4422_s1 + $0x90] sm:$0xff]  ;;  %v1850_v12 = vld [vmem:[%s4422_s1 + $0x98] sm:$0xff] }
 0x328   :  { %v1851_v38 = vld [vmem:[%s4422_s1 + $0xa0] sm:$0xff] }
 0x329   :  { %v1942_v31 = vrot.slane %v4106_v26, %v4692_v22  ;;  %v1946_v28 = vrot.slane %v4106_v26, %v4693_v24  ;;  %v1950_v49 = vrot.slane %v4106_v26, %v4694_v16  ;;  %v1954_v11 = vrot.slane %v4106_v26, %v4695_v21 }
 0x32a   :  { %v1958_v55 = vrot.slane %v4106_v26, %v4696_v18  ;;  %v1962_v46 = vrot.slane %v4106_v26, %v4697_v25  ;;  %v1966_v20 = vrot.slane %v4106_v26, %v4698_v7  ;;  %v1970_v62 = vrot.slane %v4106_v26, %v4699_v37 }
 0x32b   :  { %v1974_v8 = vrot.slane %v4110_v52, %v4692_v22  ;;  %v1978_v6 = vrot.slane %v4110_v52, %v4693_v24  ;;  %v1982_v63 = vrot.slane %v4110_v52, %v4694_v16  ;;  %v1986_v60 = vrot.slane %v4110_v52, %v4695_v21 }
 0x32c   :  { %v1990_v53 = vrot.slane %v4110_v52, %v4696_v18  ;;  %v1994_v17 = vrot.slane %v4110_v52, %v4697_v25  ;;  %v1998_v15 = vrot.slane %v4110_v52, %v4698_v7  ;;  %v2002_v45 = vrot.slane %v4110_v52, %v4699_v37 }
 0x32d   :  { %v2006_v34 = vrot.slane %v4108_v30, %v4692_v22  ;;  %v2010_v36 = vrot.slane %v4108_v30, %v4693_v24  ;;  %v2014_v5 = vrot.slane %v4108_v30, %v4694_v16  ;;  %v2018_v0 = vrot.slane %v4108_v30, %v4695_v21 }
 0x32e   :  { %v2022_v58 = vrot.slane %v4108_v30, %v4696_v18  ;;  %v2026_v43 = vrot.slane %v4108_v30, %v4697_v25  ;;  %v2030_v13 = vrot.slane %v4108_v30, %v4698_v7  ;;  %v2099_v26 = vmul.f32 %v1942_v31, %v1831_v39  ;;  %v1854_v31 = vld [vmem:[%s4422_s1 + $0xb8] sm:$0xff] }
 0x32f   :  { %v2100_v52 = vmul.f32 %v1946_v28, %v1832_v29  ;;  %v2101_v1 = vmul.f32 %v1950_v49, %v1833_v3  ;;  %v2102_v57 = vmul.f32 %v1954_v11, %v1834_v61  ;;  %v2103_v51 = vmul.f32 %v1958_v55, %v1835_v33  ;;  %v1855_v28 = vld [vmem:[%s4422_s1 + $0xc0] sm:$0xff]  ;;  %v1856_v49 = vld [vmem:[%s4422_s1 + $0xc8] sm:$0xff]  ;;  %v1857_v55 = vld [vmem:[%s4422_s1 + $0xd0] sm:$0xff] }
 0x330   :  { %v2104_v42 = vmul.f32 %v1962_v46, %v1836_v35  ;;  %v2105_v27 = vmul.f32 %v1966_v20, %v1837_v10  ;;  %v2106_v4 = vmul.f32 %v1970_v62, %v1838_v41  ;;  %v2107_v11 = vmul.f32 %v1974_v8, %v1839_v50  ;;  %2131 = vst [vmem:[%s4423_s5] sm:$0xff] %v2099_v26  ;;  %v1858_v46 = vld [vmem:[%s4422_s1 + $0xd8] sm:$0xff]  ;;  %v1859_v20 = vld [vmem:[%s4422_s1 + $0xe0] sm:$0xff]  ;;  %v1861_v61 = vld [vmem:[%s4422_s1 + $0xf0] sm:$0xff] }
 0x331   :  { %v2108_v39 = vmul.f32 %v1978_v6, %v1840_v23  ;;  %v2109_v29 = vmul.f32 %v1982_v63, %v1841_v32  ;;  %v2110_v3 = vmul.f32 %v1986_v60, %v1842_v2  ;;  %2132 = vst [vmem:[%s4423_s5 + $0x8] sm:$0xff] %v2100_v52  ;;  %2133 = vst [vmem:[%s4423_s5 + $0x10] sm:$0xff] %v2101_v1  ;;  %v1860_v60 = vld [vmem:[%s4422_s1 + $0xe8] sm:$0xff] }
 0x332   :  { %2134 = vst [vmem:[%s4423_s5 + $0x18] sm:$0xff] %v2102_v57  ;;  %v2111_v62 = vmul.f32 %v1990_v53, %v1843_v40  ;;  %v2112_v8 = vmul.f32 %v1994_v17, %v1844_v47  ;;  %v2113_v6 = vmul.f32 %v1998_v15, %v1845_v9  ;;  %v2114_v63 = vmul.f32 %v2002_v45, %v1846_v48  ;;  %v1862_v53 = vld [vmem:[%s4422_s1 + $0xf8] sm:$0xff] }
 0x333   :  { %2135 = vst [vmem:[%s4423_s5 + $0x20] sm:$0xff] %v2103_v51  ;;  %2136 = vst [vmem:[%s4423_s5 + $0x28] sm:$0xff] %v2104_v42  ;;  %v2115_v17 = vmul.f32 %v2006_v34, %v1847_v14  ;;  %v2116_v15 = vmul.f32 %v2010_v36, %v1848_v44  ;;  %v2117_v45 = vmul.f32 %v2014_v5, %v1849_v54 }
 0x334   :  { %2137 = vst [vmem:[%s4423_s5 + $0x30] sm:$0xff] %v2105_v27  ;;  %2138 = vst [vmem:[%s4423_s5 + $0x38] sm:$0xff] %v2106_v4  ;;  %v2118_v33 = vmul.f32 %v2018_v0, %v1850_v12  ;;  %v2119_v35 = vmul.f32 %v2022_v58, %v1851_v38  ;;  %v2120_v10 = vmul.f32 %v2026_v43, %v1852_v59 }
 0x335   :  { %2139 = vst [vmem:[%s4423_s5 + $0x40] sm:$0xff] %v2107_v11  ;;  %2140 = vst [vmem:[%s4423_s5 + $0x48] sm:$0xff] %v2108_v39  ;;  %v2121_v41 = vmul.f32 %v2030_v13, %v1853_v19  ;;  %v4700_v34 = vrot.slane %v4108_v30, %v4699_v37  ;;  %v4701_v30 = vrot.slane %v4112_v56, %v4692_v22 }
 0x336   :  { %2141 = vst [vmem:[%s4423_s5 + $0x50] sm:$0xff] %v2109_v29  ;;  %2142 = vst [vmem:[%s4423_s5 + $0x58] sm:$0xff] %v2110_v3  ;;  %v4702_v0 = vrot.slane %v4112_v56, %v4693_v24  ;;  %v4703_v23 = vrot.slane %v4112_v56, %v4694_v16  ;;  %v4704_v58 = vrot.slane %v4112_v56, %v4695_v21 }
 0x337   :  { %v2122_v36 = vmul.f32 %v4700_v34, %v1854_v31  ;;  %2143 = vst [vmem:[%s4423_s5 + $0x60] sm:$0xff] %v2111_v62  ;;  %2144 = vst [vmem:[%s4423_s5 + $0x68] sm:$0xff] %v2112_v8  ;;  %v2123_v5 = vmul.f32 %v4701_v30, %v1855_v28  ;;  %v4705_v22 = vrot.slane %v4112_v56, %v4696_v18 }
 0x338   :  { %2145 = vst [vmem:[%s4423_s5 + $0x70] sm:$0xff] %v2113_v6  ;;  %2146 = vst [vmem:[%s4423_s5 + $0x78] sm:$0xff] %v2114_v63  ;;  %v2124_v50 = vmul.f32 %v4702_v0, %v1856_v49  ;;  %v2125_v32 = vmul.f32 %v4703_v23, %v1857_v55  ;;  %v2126_v43 = vmul.f32 %v4704_v58, %v1858_v46 }
 0x339   :  { %2147 = vst [vmem:[%s4423_s5 + $0x80] sm:$0xff] %v2115_v17  ;;  %2148 = vst [vmem:[%s4423_s5 + $0x88] sm:$0xff] %v2116_v15  ;;  %v2127_v24 = vmul.f32 %v4705_v22, %v1859_v20  ;;  %v4706_v16 = vrot.slane %v4112_v56, %v4697_v25  ;;  %v4707_v13 = vrot.slane %v4112_v56, %v4698_v7 }
 0x33a   :  { %2149 = vst [vmem:[%s4423_s5 + $0x90] sm:$0xff] %v2117_v45  ;;  %2150 = vst [vmem:[%s4423_s5 + $0x98] sm:$0xff] %v2118_v33  ;;  %v4708_v2 = vrot.slane %v4112_v56, %v4699_v37 }
 0x33b   :  { %v2128_v21 = vmul.f32 %v4706_v16, %v1860_v60  ;;  %v2129_v4 = vmul.f32 %v4707_v13, %v1861_v61  ;;  %2151 = vst [vmem:[%s4423_s5 + $0xa0] sm:$0xff] %v2119_v35  ;;  %2152 = vst [vmem:[%s4423_s5 + $0xa8] sm:$0xff] %v2120_v10 }
 0x33c   :  { %v2130_v40 = vmul.f32 %v4708_v2, %v1862_v53  ;;  %2153 = vst [vmem:[%s4423_s5 + $0xb0] sm:$0xff] %v2121_v41  ;;  %2154 = vst [vmem:[%s4423_s5 + $0xb8] sm:$0xff] %v2122_v36 }
 0x33d   :  { %2155 = vst [vmem:[%s4423_s5 + $0xc0] sm:$0xff] %v2123_v5  ;;  %2156 = vst [vmem:[%s4423_s5 + $0xc8] sm:$0xff] %v2124_v50 }
 0x33e   :  { %2157 = vst [vmem:[%s4423_s5 + $0xd0] sm:$0xff] %v2125_v32  ;;  %2158 = vst [vmem:[%s4423_s5 + $0xd8] sm:$0xff] %v2126_v43 }
 0x33f   :  { %2159 = vst [vmem:[%s4423_s5 + $0xe0] sm:$0xff] %v2127_v24  ;;  %2160 = vst [vmem:[%s4423_s5 + $0xe8] sm:$0xff] %v2128_v21 }
 0x340   :  { %2161 = vst [vmem:[%s4423_s5 + $0xf0] sm:$0xff] %v2129_v4  ;;  %2162 = vst [vmem:[%s4423_s5 + $0xf8] sm:$0xff] %v2130_v40 }

</bundles_post_ra>
